<compile_context>
chip_gen: v6e
topology: v6e:2x2x1
jax: 0.10.0
libtpu: 0.0.40
codegen_flags: <defaults>
</compile_context>

<pallas_src>
import jax
import jax.numpy as jnp
from jax.experimental import pallas as pl
from jax.experimental.pallas import tpu as pltpu

_EPS = 1e-5     # PyTorch BatchNorm1d default eps
_KPAD = 128     # contraction / activation lane width (one lane tile)
_NPAD = 256     # packed weight lane width (two lane tiles)
_HALF = 128     # branch-1 lane offset inside the fused block weight


def _round_up(n, m):
    return ((n + m - 1) // m) * m


# ------------------------------ fused kernel -------------------------------
def _make_fused_kernel(n_blocks, d_out):
    """Kernel refs: x, w_slab, b_slab, out."""

    def kernel(x_ref, w_ref, b_ref, o_ref):
        f32 = jnp.float32

        def mm(act, k):
            # one uniform MXU matmul against packed matrix k:
            # [tb,128] @ [128,256] -> [tb,256], f32 accumulation.
            return jnp.dot(act.astype(w_ref.dtype), w_ref[k],
                           preferred_element_type=f32)

        x = x_ref[...].astype(f32)                     # [tb, d_in]
        tb, d_in = x.shape
        if d_in < _KPAD:                               # pad to 128 lanes; pads stay 0
            x = jnp.concatenate([x, jnp.zeros((tb, _KPAD - d_in), f32)], axis=1)

        # ---- SELayer on the input: sigmoid(relu(x@W1)@W2) * x ----
        h = jnp.maximum(mm(x, 0)[:, :_KPAD], 0.0)
        gate = jax.nn.sigmoid(mm(h, 1)[:, :_KPAD])
        out = gate * x                                 # padding lanes stay 0

        # ---- SEResBlocks (statically unrolled) ----
        for blk in range(n_blocks):
            k = 2 + 3 * blk
            # both FeedForwardLayer branches in one matmul (BN folded, bias fused)
            h01 = jnp.maximum(mm(out, k) + b_ref[blk], 0.0)   # [tb, 256]
            h0 = h01[:, :_HALF]        # branch 0 -> whole first lane tile
            h1 = h01[:, _HALF:]        # branch 1 -> starts at lane 128 (no relayout)
            # SE gating on branch 1
            s = jnp.maximum(mm(h1, k + 1)[:, :_KPAD], 0.0)
            se = jax.nn.sigmoid(mm(s, k + 2)[:, :_KPAD])
            out = h0 + se * h1         # padding lanes stay 0

        # ---- final head Linear ----
        y = mm(out, 2 + 3 * n_blocks)[:, :d_out] + b_ref[n_blocks][:d_out]
        o_ref[...] = y.astype(o_ref.dtype)

    return kernel


def se_classifier_forward(packed, x, *, tile_b=1024, core_parallel=False):
    """Single fused pallas_call over the whole model."""
    B, d_in = x.shape
    assert d_in <= _KPAD, "packing assumes <= 128 input features"
    n_blocks, d_out = packed['n_blocks'], packed['d_out']
    w_slab, b_slab = packed['w'], packed['b']

    # Big tiles for large B (HBM-bound on streaming x), but keep >= 2 grid
    # steps once B >= 16 so a dual-TensorCore chip can split the batch axis.
    tb = max(8, min(tile_b, _round_up(pl.cdiv(B, 2), 8)))
    grid = (pl.cdiv(B, tb),)

    # Weight/bias slabs have a constant block index -> the pipeliner DMAs them
    # into VMEM once and keeps them resident across all batch steps.
    in_specs = [
        pl.BlockSpec((tb, d_in), lambda i: (i, 0)),            # streamed activations
        pl.BlockSpec(w_slab.shape, lambda i: (0, 0, 0)),       # resident weight slab
        pl.BlockSpec(b_slab.shape, lambda i: (0, 0)),          # resident bias slab
    ]
    out_specs = pl.BlockSpec((tb, d_out), lambda i: (i, 0))

    dim_sem = (pltpu.CORE_PARALLEL,) if core_parallel else ("parallel",)
    return pl.pallas_call(
        _make_fused_kernel(n_blocks, d_out),
        out_shape=jax.ShapeDtypeStruct((B, d_out), x.dtype),
        grid=grid,
        in_specs=in_specs,
        out_specs=out_specs,
        compiler_params=pltpu.CompilerParams(dimension_semantics=dim_sem),
    )(x, w_slab, b_slab)


# ----------------------- parameter init / pack / ref -----------------------
def init_params(key, input_shape=64, n_layers=3, output_shape=8):
    keys = iter(jax.random.split(key, 64))

    def lin(din, dout):
        return jax.random.normal(next(keys), (din, dout), jnp.float32) / jnp.sqrt(float(din))

    def bias(dout):
        return 0.05 * jax.random.normal(next(keys), (1, dout), jnp.float32)

    def bn(dout):
        g = 1.0 + 0.1 * jax.random.normal(next(keys), (1, dout), jnp.float32)
        be = 0.1 * jax.random.normal(next(keys), (1, dout), jnp.float32)
        m = 0.1 * jax.random.normal(next(keys), (1, dout), jnp.float32)
        v = 1.0 + 0.1 * jax.random.uniform(next(keys), (1, dout), jnp.float32)
        return g, be, m, v

    params = {'attn': dict(w1=lin(input_shape, input_shape // 2),
                           w2=lin(input_shape // 2, input_shape))}
    blocks = []
    din = input_shape
    for _ in range(n_layers + 1):  # SEResBlock(in, in//2), then n_layers more halving blocks
        dout = din // 2
        g0, be0, m0, v0 = bn(dout)
        g1, be1, m1, v1 = bn(dout)
        blocks.append(dict(
            w0=lin(din, dout), b0=bias(dout), g0=g0, be0=be0, m0=m0, v0=v0,
            w1=lin(din, dout), b1=bias(dout), g1=g1, be1=be1, m1=m1, v1=v1,
            ws1=lin(dout, dout // 2), ws2=lin(dout // 2, dout)))
        din = dout
    params['blocks'] = blocks
    params['head'] = dict(w=lin(din, output_shape), b=bias(output_shape))
    return params


def fold_and_pack(params, *, weight_dtype=jnp.bfloat16):
    """Fold eval-mode BN into the Linears (f32), zero-pad every matmul weight to
    [128, 256] (branch1 of each block placed at lane 128), and stack everything
    into one weight slab + one f32 bias slab."""
    f32 = jnp.float32

    def fold(w, b, g, be, m, v):
        s = g * jax.lax.rsqrt(v + _EPS)        # [1, dout] column scale
        return w * s, (b - m) * s + be

    def pad_w(w):
        r, c = w.shape
        assert r <= _KPAD and c <= _NPAD
        return jnp.pad(w.astype(f32), ((0, _KPAD - r), (0, _NPAD - c)))

    mats = [pad_w(params['attn']['w1']), pad_w(params['attn']['w2'])]
    bias_rows = []
    for blk in params['blocks']:
        w0, b0 = fold(blk['w0'], blk['b0'], blk['g0'], blk['be0'], blk['m0'], blk['v0'])
        w1, b1 = fold(blk['w1'], blk['b1'], blk['g1'], blk['be1'], blk['m1'], blk['v1'])
        din, dout = w0.shape
        # lane-aligned fusion: branch0 -> lanes [0,dout), branch1 -> lanes [128,128+dout)
        wcat = jnp.zeros((_KPAD, _NPAD), f32)
        wcat = wcat.at[:din, :dout].set(w0).at[:din, _HALF:_HALF + dout].set(w1)
        bcat = jnp.zeros((_NPAD,), f32)
        bcat = bcat.at[:dout].set(b0[0]).at[_HALF:_HALF + dout].set(b1[0])
        mats += [wcat, pad_w(blk['ws1']), pad_w(blk['ws2'])]
        bias_rows.append(bcat)

    hw, hb = params['head']['w'], params['head']['b']
    d_out = hw.shape[1]
    mats.append(pad_w(hw))
    bias_rows.append(jnp.zeros((_NPAD,), f32).at[:d_out].set(hb[0]))

    w_slab = jnp.stack(mats).astype(weight_dtype)      # [n_mats, 128, 256]
    b_slab = jnp.stack(bias_rows)                      # [n_blocks+1, 256] f32
    b_slab = jnp.pad(b_slab, ((0, (-b_slab.shape[0]) % 8), (0, 0)))   # sublane-tidy
    return dict(w=w_slab, b=b_slab, n_blocks=len(params['blocks']), d_out=d_out)


def ref_forward(params, x):
    """Pure-JAX reference, using the UNfolded parameters (checks the BN fold too)."""
    def ref_se(h, w1, w2):
        return jax.nn.sigmoid(jnp.maximum(h @ w1, 0.0) @ w2) * h

    def ref_lbr(h, w, b, g, be, m, v):
        z = h @ w + b
        z = (z - m) * jax.lax.rsqrt(v + _EPS) * g + be
        return jnp.maximum(z, 0.0)

    out = ref_se(x, params['attn']['w1'], params['attn']['w2'])
    for blk in params['blocks']:
        h0 = ref_lbr(out, blk['w0'], blk['b0'], blk['g0'], blk['be0'], blk['m0'], blk['v0'])
        h1 = ref_lbr(out, blk['w1'], blk['b1'], blk['g1'], blk['be1'], blk['m1'], blk['v1'])
        out = h0 + ref_se(h1, blk['ws1'], blk['ws2'])
    return out @ params['head']['w'] + params['head']['b']


if __name__ == "__main__":
    INPUT_SHAPE, N_LAYERS, OUTPUT_SHAPE, BATCH = 64, 3, 8, 8
    key = jax.random.PRNGKey(0)
    kp, kx = jax.random.split(key)
    params = init_params(kp, INPUT_SHAPE, N_LAYERS, OUTPUT_SHAPE)
    x = jax.random.normal(kx, (BATCH, INPUT_SHAPE), jnp.float32)
    ref = ref_forward(params, x)

    # f32 weight slab: exact structural check of packing/folding/slicing.
    packed_f32 = fold_and_pack(params, weight_dtype=jnp.float32)
    out_f32 = jax.block_until_ready(se_classifier_forward(packed_f32, x))
    assert out_f32.shape == (BATCH, OUTPUT_SHAPE), out_f32.shape
    assert jnp.allclose(out_f32, ref, atol=1e-4, rtol=1e-4), "f32 mismatch vs JAX reference"

    # bf16 MXU-operand slab (the perf path on v5e/v6e/v7x): looser tolerance.
    packed_bf16 = fold_and_pack(params, weight_dtype=jnp.bfloat16)
    out_bf16 = jax.block_until_ready(se_classifier_forward(packed_bf16, x))
    assert out_bf16.shape == (BATCH, OUTPUT_SHAPE), out_bf16.shape
    assert jnp.allclose(out_bf16, ref, atol=5e-2, rtol=5e-2), "bf16 mismatch vs JAX reference"

    print("KERNEL_OK")
</pallas_src>

<mosaic_0001>
module attributes {stable_mosaic.version = 11 : i64} {
  func.func @kernel(%arg0: i32, %arg1: memref<8x64xf32, #tpu.memory_space<vmem>>, %arg2: memref<15x128x256xf32, #tpu.memory_space<vmem>>, %arg3: memref<8x256xf32, #tpu.memory_space<vmem>>, %arg4: memref<8x8xf32, #tpu.memory_space<vmem>>) attributes {dimension_semantics = [#tpu.dimension_semantics<parallel>], iteration_bounds = array<i64: 1>, scalar_prefetch = 0 : i64, scratch_operands = 0 : i64, tpu.core_type = #tpu.core_type<tc>, window_params = [{transform_indices = @transform_0, window_bounds = array<i64: 8, 64>}, {pipeline_mode = #tpu.pipeline_mode<synchronous>, transform_indices = @transform_1, window_bounds = array<i64: 15, 128, 256>}, {pipeline_mode = #tpu.pipeline_mode<synchronous>, transform_indices = @transform_2, window_bounds = array<i64: 8, 256>}, {transform_indices = @transform_3, window_bounds = array<i64: 8, 8>}]} {
    %c0 = arith.constant 0 : index
    %c0_0 = arith.constant 0 : index
    %0 = vector.load %arg1[%c0, %c0_0] : memref<8x64xf32, #tpu.memory_space<vmem>>, vector<8x64xf32>
    %cst = arith.constant 0.000000e+00 : f32
    %1 = vector.broadcast %cst : f32 to vector<8x64xf32>
    %2 = tpu.concatenate %0, %1 in 1 : vector<8x64xf32>, vector<8x64xf32> -> vector<8x128xf32>
    %c0_1 = arith.constant 0 : index
    %c0_2 = arith.constant 0 : index
    %c0_3 = arith.constant 0 : index
    %3 = vector.load %arg2[%c0_1, %c0_2, %c0_3] : memref<15x128x256xf32, #tpu.memory_space<vmem>>, vector<1x128x256xf32>
    %4 = vector.shape_cast %3 : vector<1x128x256xf32> to vector<128x256xf32>
    %cst_4 = arith.constant dense<0.000000e+00> : vector<8x256xf32>
    %5 = tpu.matmul %2, %4, %cst_4 {dimension_numbers = #tpu.dot_dimension_numbers<[1], [0], [0], [1], [0, 0, 1, 1], [], []>} : vector<8x128xf32>, vector<128x256xf32>, vector<8x256xf32> -> vector<8x256xf32>
    %6 = vector.extract_strided_slice %5 {offsets = [0, 0], sizes = [8, 128], strides = [1, 1]} : vector<8x256xf32> to vector<8x128xf32>
    %cst_5 = arith.constant 0.000000e+00 : f32
    %7 = vector.broadcast %cst_5 : f32 to vector<8x128xf32>
    %8 = arith.maximumf %6, %7 : vector<8x128xf32>
    %c1 = arith.constant 1 : index
    %c0_6 = arith.constant 0 : index
    %c0_7 = arith.constant 0 : index
    %9 = vector.load %arg2[%c1, %c0_6, %c0_7] : memref<15x128x256xf32, #tpu.memory_space<vmem>>, vector<1x128x256xf32>
    %10 = vector.shape_cast %9 : vector<1x128x256xf32> to vector<128x256xf32>
    %cst_8 = arith.constant dense<0.000000e+00> : vector<8x256xf32>
    %11 = tpu.matmul %8, %10, %cst_8 {dimension_numbers = #tpu.dot_dimension_numbers<[1], [0], [0], [1], [0, 0, 1, 1], [], []>} : vector<8x128xf32>, vector<128x256xf32>, vector<8x256xf32> -> vector<8x256xf32>
    %12 = vector.extract_strided_slice %11 {offsets = [0, 0], sizes = [8, 128], strides = [1, 1]} : vector<8x256xf32> to vector<8x128xf32>
    %13 = arith.negf %12 : vector<8x128xf32>
    %14 = math.exp %13 : vector<8x128xf32>
    %cst_9 = arith.constant 1.000000e+00 : f32
    %15 = vector.broadcast %cst_9 : f32 to vector<8x128xf32>
    %16 = arith.addf %15, %14 : vector<8x128xf32>
    %17 = arith.divf %15, %16 : vector<8x128xf32>
    %18 = arith.mulf %17, %2 : vector<8x128xf32>
    %c2 = arith.constant 2 : index
    %c0_10 = arith.constant 0 : index
    %c0_11 = arith.constant 0 : index
    %19 = vector.load %arg2[%c2, %c0_10, %c0_11] : memref<15x128x256xf32, #tpu.memory_space<vmem>>, vector<1x128x256xf32>
    %20 = vector.shape_cast %19 : vector<1x128x256xf32> to vector<128x256xf32>
    %cst_12 = arith.constant dense<0.000000e+00> : vector<8x256xf32>
    %21 = tpu.matmul %18, %20, %cst_12 {dimension_numbers = #tpu.dot_dimension_numbers<[1], [0], [0], [1], [0, 0, 1, 1], [], []>} : vector<8x128xf32>, vector<128x256xf32>, vector<8x256xf32> -> vector<8x256xf32>
    %c0_13 = arith.constant 0 : index
    %c0_14 = arith.constant 0 : index
    %22 = vector.load %arg3[%c0_13, %c0_14] : memref<8x256xf32, #tpu.memory_space<vmem>>, vector<1x256xf32>
    %23 = vector.shape_cast %22 : vector<1x256xf32> to vector<256xf32>
    %24 = vector.shape_cast %23 : vector<256xf32> to vector<1x256xf32>
    %25 = vector.broadcast %24 : vector<1x256xf32> to vector<8x256xf32>
    %26 = arith.addf %21, %25 : vector<8x256xf32>
    %cst_15 = arith.constant 0.000000e+00 : f32
    %27 = vector.broadcast %cst_15 : f32 to vector<8x256xf32>
    %28 = arith.maximumf %26, %27 : vector<8x256xf32>
    %29 = vector.extract_strided_slice %28 {offsets = [0, 0], sizes = [8, 128], strides = [1, 1]} : vector<8x256xf32> to vector<8x128xf32>
    %30 = vector.extract_strided_slice %28 {offsets = [0, 128], sizes = [8, 128], strides = [1, 1]} : vector<8x256xf32> to vector<8x128xf32>
    %c3 = arith.constant 3 : index
    %c0_16 = arith.constant 0 : index
    %c0_17 = arith.constant 0 : index
    %31 = vector.load %arg2[%c3, %c0_16, %c0_17] : memref<15x128x256xf32, #tpu.memory_space<vmem>>, vector<1x128x256xf32>
    %32 = vector.shape_cast %31 : vector<1x128x256xf32> to vector<128x256xf32>
    %cst_18 = arith.constant dense<0.000000e+00> : vector<8x256xf32>
    %33 = tpu.matmul %30, %32, %cst_18 {dimension_numbers = #tpu.dot_dimension_numbers<[1], [0], [0], [1], [0, 0, 1, 1], [], []>} : vector<8x128xf32>, vector<128x256xf32>, vector<8x256xf32> -> vector<8x256xf32>
    %34 = vector.extract_strided_slice %33 {offsets = [0, 0], sizes = [8, 128], strides = [1, 1]} : vector<8x256xf32> to vector<8x128xf32>
    %cst_19 = arith.constant 0.000000e+00 : f32
    %35 = vector.broadcast %cst_19 : f32 to vector<8x128xf32>
    %36 = arith.maximumf %34, %35 : vector<8x128xf32>
    %c4 = arith.constant 4 : index
    %c0_20 = arith.constant 0 : index
    %c0_21 = arith.constant 0 : index
    %37 = vector.load %arg2[%c4, %c0_20, %c0_21] : memref<15x128x256xf32, #tpu.memory_space<vmem>>, vector<1x128x256xf32>
    %38 = vector.shape_cast %37 : vector<1x128x256xf32> to vector<128x256xf32>
    %cst_22 = arith.constant dense<0.000000e+00> : vector<8x256xf32>
    %39 = tpu.matmul %36, %38, %cst_22 {dimension_numbers = #tpu.dot_dimension_numbers<[1], [0], [0], [1], [0, 0, 1, 1], [], []>} : vector<8x128xf32>, vector<128x256xf32>, vector<8x256xf32> -> vector<8x256xf32>
    %40 = vector.extract_strided_slice %39 {offsets = [0, 0], sizes = [8, 128], strides = [1, 1]} : vector<8x256xf32> to vector<8x128xf32>
    %41 = arith.negf %40 : vector<8x128xf32>
    %42 = math.exp %41 : vector<8x128xf32>
    %cst_23 = arith.constant 1.000000e+00 : f32
    %43 = vector.broadcast %cst_23 : f32 to vector<8x128xf32>
    %44 = arith.addf %43, %42 : vector<8x128xf32>
    %45 = arith.divf %43, %44 : vector<8x128xf32>
    %46 = arith.mulf %45, %30 : vector<8x128xf32>
    %47 = arith.addf %29, %46 : vector<8x128xf32>
    %c5 = arith.constant 5 : index
    %c0_24 = arith.constant 0 : index
    %c0_25 = arith.constant 0 : index
    %48 = vector.load %arg2[%c5, %c0_24, %c0_25] : memref<15x128x256xf32, #tpu.memory_space<vmem>>, vector<1x128x256xf32>
    %49 = vector.shape_cast %48 : vector<1x128x256xf32> to vector<128x256xf32>
    %cst_26 = arith.constant dense<0.000000e+00> : vector<8x256xf32>
    %50 = tpu.matmul %47, %49, %cst_26 {dimension_numbers = #tpu.dot_dimension_numbers<[1], [0], [0], [1], [0, 0, 1, 1], [], []>} : vector<8x128xf32>, vector<128x256xf32>, vector<8x256xf32> -> vector<8x256xf32>
    %c1_27 = arith.constant 1 : index
    %c0_28 = arith.constant 0 : index
    %51 = vector.load %arg3[%c1_27, %c0_28] : memref<8x256xf32, #tpu.memory_space<vmem>>, vector<1x256xf32>
    %52 = vector.shape_cast %51 : vector<1x256xf32> to vector<256xf32>
    %53 = vector.shape_cast %52 : vector<256xf32> to vector<1x256xf32>
    %54 = vector.broadcast %53 : vector<1x256xf32> to vector<8x256xf32>
    %55 = arith.addf %50, %54 : vector<8x256xf32>
    %cst_29 = arith.constant 0.000000e+00 : f32
    %56 = vector.broadcast %cst_29 : f32 to vector<8x256xf32>
    %57 = arith.maximumf %55, %56 : vector<8x256xf32>
    %58 = vector.extract_strided_slice %57 {offsets = [0, 0], sizes = [8, 128], strides = [1, 1]} : vector<8x256xf32> to vector<8x128xf32>
    %59 = vector.extract_strided_slice %57 {offsets = [0, 128], sizes = [8, 128], strides = [1, 1]} : vector<8x256xf32> to vector<8x128xf32>
    %c6 = arith.constant 6 : index
    %c0_30 = arith.constant 0 : index
    %c0_31 = arith.constant 0 : index
    %60 = vector.load %arg2[%c6, %c0_30, %c0_31] : memref<15x128x256xf32, #tpu.memory_space<vmem>>, vector<1x128x256xf32>
    %61 = vector.shape_cast %60 : vector<1x128x256xf32> to vector<128x256xf32>
    %cst_32 = arith.constant dense<0.000000e+00> : vector<8x256xf32>
    %62 = tpu.matmul %59, %61, %cst_32 {dimension_numbers = #tpu.dot_dimension_numbers<[1], [0], [0], [1], [0, 0, 1, 1], [], []>} : vector<8x128xf32>, vector<128x256xf32>, vector<8x256xf32> -> vector<8x256xf32>
    %63 = vector.extract_strided_slice %62 {offsets = [0, 0], sizes = [8, 128], strides = [1, 1]} : vector<8x256xf32> to vector<8x128xf32>
    %cst_33 = arith.constant 0.000000e+00 : f32
    %64 = vector.broadcast %cst_33 : f32 to vector<8x128xf32>
    %65 = arith.maximumf %63, %64 : vector<8x128xf32>
    %c7 = arith.constant 7 : index
    %c0_34 = arith.constant 0 : index
    %c0_35 = arith.constant 0 : index
    %66 = vector.load %arg2[%c7, %c0_34, %c0_35] : memref<15x128x256xf32, #tpu.memory_space<vmem>>, vector<1x128x256xf32>
    %67 = vector.shape_cast %66 : vector<1x128x256xf32> to vector<128x256xf32>
    %cst_36 = arith.constant dense<0.000000e+00> : vector<8x256xf32>
    %68 = tpu.matmul %65, %67, %cst_36 {dimension_numbers = #tpu.dot_dimension_numbers<[1], [0], [0], [1], [0, 0, 1, 1], [], []>} : vector<8x128xf32>, vector<128x256xf32>, vector<8x256xf32> -> vector<8x256xf32>
    %69 = vector.extract_strided_slice %68 {offsets = [0, 0], sizes = [8, 128], strides = [1, 1]} : vector<8x256xf32> to vector<8x128xf32>
    %70 = arith.negf %69 : vector<8x128xf32>
    %71 = math.exp %70 : vector<8x128xf32>
    %cst_37 = arith.constant 1.000000e+00 : f32
    %72 = vector.broadcast %cst_37 : f32 to vector<8x128xf32>
    %73 = arith.addf %72, %71 : vector<8x128xf32>
    %74 = arith.divf %72, %73 : vector<8x128xf32>
    %75 = arith.mulf %74, %59 : vector<8x128xf32>
    %76 = arith.addf %58, %75 : vector<8x128xf32>
    %c8 = arith.constant 8 : index
    %c0_38 = arith.constant 0 : index
    %c0_39 = arith.constant 0 : index
    %77 = vector.load %arg2[%c8, %c0_38, %c0_39] : memref<15x128x256xf32, #tpu.memory_space<vmem>>, vector<1x128x256xf32>
    %78 = vector.shape_cast %77 : vector<1x128x256xf32> to vector<128x256xf32>
    %cst_40 = arith.constant dense<0.000000e+00> : vector<8x256xf32>
    %79 = tpu.matmul %76, %78, %cst_40 {dimension_numbers = #tpu.dot_dimension_numbers<[1], [0], [0], [1], [0, 0, 1, 1], [], []>} : vector<8x128xf32>, vector<128x256xf32>, vector<8x256xf32> -> vector<8x256xf32>
    %c2_41 = arith.constant 2 : index
    %c0_42 = arith.constant 0 : index
    %80 = vector.load %arg3[%c2_41, %c0_42] : memref<8x256xf32, #tpu.memory_space<vmem>>, vector<1x256xf32>
    %81 = vector.shape_cast %80 : vector<1x256xf32> to vector<256xf32>
    %82 = vector.shape_cast %81 : vector<256xf32> to vector<1x256xf32>
    %83 = vector.broadcast %82 : vector<1x256xf32> to vector<8x256xf32>
    %84 = arith.addf %79, %83 : vector<8x256xf32>
    %cst_43 = arith.constant 0.000000e+00 : f32
    %85 = vector.broadcast %cst_43 : f32 to vector<8x256xf32>
    %86 = arith.maximumf %84, %85 : vector<8x256xf32>
    %87 = vector.extract_strided_slice %86 {offsets = [0, 0], sizes = [8, 128], strides = [1, 1]} : vector<8x256xf32> to vector<8x128xf32>
    %88 = vector.extract_strided_slice %86 {offsets = [0, 128], sizes = [8, 128], strides = [1, 1]} : vector<8x256xf32> to vector<8x128xf32>
    %c9 = arith.constant 9 : index
    %c0_44 = arith.constant 0 : index
    %c0_45 = arith.constant 0 : index
    %89 = vector.load %arg2[%c9, %c0_44, %c0_45] : memref<15x128x256xf32, #tpu.memory_space<vmem>>, vector<1x128x256xf32>
    %90 = vector.shape_cast %89 : vector<1x128x256xf32> to vector<128x256xf32>
    %cst_46 = arith.constant dense<0.000000e+00> : vector<8x256xf32>
    %91 = tpu.matmul %88, %90, %cst_46 {dimension_numbers = #tpu.dot_dimension_numbers<[1], [0], [0], [1], [0, 0, 1, 1], [], []>} : vector<8x128xf32>, vector<128x256xf32>, vector<8x256xf32> -> vector<8x256xf32>
    %92 = vector.extract_strided_slice %91 {offsets = [0, 0], sizes = [8, 128], strides = [1, 1]} : vector<8x256xf32> to vector<8x128xf32>
    %cst_47 = arith.constant 0.000000e+00 : f32
    %93 = vector.broadcast %cst_47 : f32 to vector<8x128xf32>
    %94 = arith.maximumf %92, %93 : vector<8x128xf32>
    %c10 = arith.constant 10 : index
    %c0_48 = arith.constant 0 : index
    %c0_49 = arith.constant 0 : index
    %95 = vector.load %arg2[%c10, %c0_48, %c0_49] : memref<15x128x256xf32, #tpu.memory_space<vmem>>, vector<1x128x256xf32>
    %96 = vector.shape_cast %95 : vector<1x128x256xf32> to vector<128x256xf32>
    %cst_50 = arith.constant dense<0.000000e+00> : vector<8x256xf32>
    %97 = tpu.matmul %94, %96, %cst_50 {dimension_numbers = #tpu.dot_dimension_numbers<[1], [0], [0], [1], [0, 0, 1, 1], [], []>} : vector<8x128xf32>, vector<128x256xf32>, vector<8x256xf32> -> vector<8x256xf32>
    %98 = vector.extract_strided_slice %97 {offsets = [0, 0], sizes = [8, 128], strides = [1, 1]} : vector<8x256xf32> to vector<8x128xf32>
    %99 = arith.negf %98 : vector<8x128xf32>
    %100 = math.exp %99 : vector<8x128xf32>
    %cst_51 = arith.constant 1.000000e+00 : f32
    %101 = vector.broadcast %cst_51 : f32 to vector<8x128xf32>
    %102 = arith.addf %101, %100 : vector<8x128xf32>
    %103 = arith.divf %101, %102 : vector<8x128xf32>
    %104 = arith.mulf %103, %88 : vector<8x128xf32>
    %105 = arith.addf %87, %104 : vector<8x128xf32>
    %c11 = arith.constant 11 : index
    %c0_52 = arith.constant 0 : index
    %c0_53 = arith.constant 0 : index
    %106 = vector.load %arg2[%c11, %c0_52, %c0_53] : memref<15x128x256xf32, #tpu.memory_space<vmem>>, vector<1x128x256xf32>
    %107 = vector.shape_cast %106 : vector<1x128x256xf32> to vector<128x256xf32>
    %cst_54 = arith.constant dense<0.000000e+00> : vector<8x256xf32>
    %108 = tpu.matmul %105, %107, %cst_54 {dimension_numbers = #tpu.dot_dimension_numbers<[1], [0], [0], [1], [0, 0, 1, 1], [], []>} : vector<8x128xf32>, vector<128x256xf32>, vector<8x256xf32> -> vector<8x256xf32>
    %c3_55 = arith.constant 3 : index
    %c0_56 = arith.constant 0 : index
    %109 = vector.load %arg3[%c3_55, %c0_56] : memref<8x256xf32, #tpu.memory_space<vmem>>, vector<1x256xf32>
    %110 = vector.shape_cast %109 : vector<1x256xf32> to vector<256xf32>
    %111 = vector.shape_cast %110 : vector<256xf32> to vector<1x256xf32>
    %112 = vector.broadcast %111 : vector<1x256xf32> to vector<8x256xf32>
    %113 = arith.addf %108, %112 : vector<8x256xf32>
    %cst_57 = arith.constant 0.000000e+00 : f32
    %114 = vector.broadcast %cst_57 : f32 to vector<8x256xf32>
    %115 = arith.maximumf %113, %114 : vector<8x256xf32>
    %116 = vector.extract_strided_slice %115 {offsets = [0, 0], sizes = [8, 128], strides = [1, 1]} : vector<8x256xf32> to vector<8x128xf32>
    %117 = vector.extract_strided_slice %115 {offsets = [0, 128], sizes = [8, 128], strides = [1, 1]} : vector<8x256xf32> to vector<8x128xf32>
    %c12 = arith.constant 12 : index
    %c0_58 = arith.constant 0 : index
    %c0_59 = arith.constant 0 : index
    %118 = vector.load %arg2[%c12, %c0_58, %c0_59] : memref<15x128x256xf32, #tpu.memory_space<vmem>>, vector<1x128x256xf32>
    %119 = vector.shape_cast %118 : vector<1x128x256xf32> to vector<128x256xf32>
    %cst_60 = arith.constant dense<0.000000e+00> : vector<8x256xf32>
    %120 = tpu.matmul %117, %119, %cst_60 {dimension_numbers = #tpu.dot_dimension_numbers<[1], [0], [0], [1], [0, 0, 1, 1], [], []>} : vector<8x128xf32>, vector<128x256xf32>, vector<8x256xf32> -> vector<8x256xf32>
    %121 = vector.extract_strided_slice %120 {offsets = [0, 0], sizes = [8, 128], strides = [1, 1]} : vector<8x256xf32> to vector<8x128xf32>
    %cst_61 = arith.constant 0.000000e+00 : f32
    %122 = vector.broadcast %cst_61 : f32 to vector<8x128xf32>
    %123 = arith.maximumf %121, %122 : vector<8x128xf32>
    %c13 = arith.constant 13 : index
    %c0_62 = arith.constant 0 : index
    %c0_63 = arith.constant 0 : index
    %124 = vector.load %arg2[%c13, %c0_62, %c0_63] : memref<15x128x256xf32, #tpu.memory_space<vmem>>, vector<1x128x256xf32>
    %125 = vector.shape_cast %124 : vector<1x128x256xf32> to vector<128x256xf32>
    %cst_64 = arith.constant dense<0.000000e+00> : vector<8x256xf32>
    %126 = tpu.matmul %123, %125, %cst_64 {dimension_numbers = #tpu.dot_dimension_numbers<[1], [0], [0], [1], [0, 0, 1, 1], [], []>} : vector<8x128xf32>, vector<128x256xf32>, vector<8x256xf32> -> vector<8x256xf32>
    %127 = vector.extract_strided_slice %126 {offsets = [0, 0], sizes = [8, 128], strides = [1, 1]} : vector<8x256xf32> to vector<8x128xf32>
    %128 = arith.negf %127 : vector<8x128xf32>
    %129 = math.exp %128 : vector<8x128xf32>
    %cst_65 = arith.constant 1.000000e+00 : f32
    %130 = vector.broadcast %cst_65 : f32 to vector<8x128xf32>
    %131 = arith.addf %130, %129 : vector<8x128xf32>
    %132 = arith.divf %130, %131 : vector<8x128xf32>
    %133 = arith.mulf %132, %117 : vector<8x128xf32>
    %134 = arith.addf %116, %133 : vector<8x128xf32>
    %c14 = arith.constant 14 : index
    %c0_66 = arith.constant 0 : index
    %c0_67 = arith.constant 0 : index
    %135 = vector.load %arg2[%c14, %c0_66, %c0_67] : memref<15x128x256xf32, #tpu.memory_space<vmem>>, vector<1x128x256xf32>
    %136 = vector.shape_cast %135 : vector<1x128x256xf32> to vector<128x256xf32>
    %cst_68 = arith.constant dense<0.000000e+00> : vector<8x256xf32>
    %137 = tpu.matmul %134, %136, %cst_68 {dimension_numbers = #tpu.dot_dimension_numbers<[1], [0], [0], [1], [0, 0, 1, 1], [], []>} : vector<8x128xf32>, vector<128x256xf32>, vector<8x256xf32> -> vector<8x256xf32>
    %138 = vector.extract_strided_slice %137 {offsets = [0, 0], sizes = [8, 8], strides = [1, 1]} : vector<8x256xf32> to vector<8x8xf32>
    %c4_69 = arith.constant 4 : index
    %c0_70 = arith.constant 0 : index
    %139 = vector.load %arg3[%c4_69, %c0_70] : memref<8x256xf32, #tpu.memory_space<vmem>>, vector<1x256xf32>
    %140 = vector.shape_cast %139 : vector<1x256xf32> to vector<256xf32>
    %141 = vector.extract_strided_slice %140 {offsets = [0], sizes = [8], strides = [1]} : vector<256xf32> to vector<8xf32>
    %142 = vector.shape_cast %141 : vector<8xf32> to vector<1x8xf32>
    %143 = vector.broadcast %142 : vector<1x8xf32> to vector<8x8xf32>
    %144 = arith.addf %138, %143 : vector<8x8xf32>
    %c0_71 = arith.constant 0 : index
    %c0_72 = arith.constant 0 : index
    %145 = vector.load %arg4[%c0_71, %c0_72] : memref<8x8xf32, #tpu.memory_space<vmem>>, vector<8x8xf32>
    tpu.vector_store %arg4[%c0_71, %c0_72], %144 {strides = array<i32>} : memref<8x8xf32, #tpu.memory_space<vmem>>, vector<8x8xf32>,
    return
  }
  func.func @transform_0(%arg0: i32) -> (i32, i32) {
    %c0_i32 = arith.constant 0 : i32
    %c0_i32_0 = arith.constant 0 : i32
    return %arg0, %c0_i32 : i32, i32
  }
  func.func @transform_1(%arg0: i32) -> (i32, i32, i32) {
    %c0_i32 = arith.constant 0 : i32
    %c0_i32_0 = arith.constant 0 : i32
    %c0_i32_1 = arith.constant 0 : i32
    %c0_i32_2 = arith.constant 0 : i32
    return %c0_i32, %c0_i32_0, %c0_i32_1 : i32, i32, i32
  }
  func.func @transform_2(%arg0: i32) -> (i32, i32) {
    %c0_i32 = arith.constant 0 : i32
    %c0_i32_0 = arith.constant 0 : i32
    %c0_i32_1 = arith.constant 0 : i32
    return %c0_i32, %c0_i32_0 : i32, i32
  }
  func.func @transform_3(%arg0: i32) -> (i32, i32) {
    %c0_i32 = arith.constant 0 : i32
    %c0_i32_0 = arith.constant 0 : i32
    return %arg0, %c0_i32 : i32, i32
  }
}

</mosaic_0001>

<bundles_post_ra>
// kernel: tpu_custom_call.1
= control target key start
LH: loop header
LB: loop body
LE: loop exit
PB: predicated region body
PF: predicated region fallthrough
CT: control target
= control target key end

     0   :  { %8 = vsyncpa [#allocation3], 0  ;;  %s1988_s0 = inlined_call_operand.hbm [shape: f32[8,64], index: 0, kind: input, shape index: {}]   ;;  %s1989_s1 = inlined_call_operand.hbm [shape: f32[15,128,256], index: 1, kind: input, shape index: {}]   ;;  %s1990_s2 = inlined_call_operand.hbm [shape: f32[8,256], index: 2, kind: input, shape index: {}]   ;;  %s1991_s3 = inlined_call_operand.hbm [shape: f32[8,8], index: 3, kind: output, shape index: {}]  }
   0x1   :  { %9 = vsyncpa [#allocation6], 0 }
   0x2   :  { %10 = vsyncpa [#allocation4], 0  ;;  %s1852_s12 = smov [#allocation5]  }
   0x3   :  { %s26_s13 = sshll.u32 %s1852_s12, 4  ;;  %s27_s13 = int_to_ptr.vmem [resolvable:$true] %s26_s13 }
   0x4   :  { %s1774_s14 = scalar_lea.vmem %s27_s13, 61440  ;;  %p1779_p1 = scmp.lt.s32.totalorder %s27_s13, %s27_s13 }
   0x5   :  { %p1775_p0 = scmp.ne.s32.totalorder %s27_s13, %s1774_s14  ;;  %p1780_p2 = scmp.lt.s32.totalorder %s1774_s14, %s1774_s14 }
   0x7   :  { %p1781_p3 = por %p1780_p2, %p1779_p1 }
   0x9   :  { %p1782_p4 = pnand %p1781_p3, %p1775_p0 }
   0xb   :  { %1785 = shalt.err (!%p1782_p4)
}
   0xc   :  { %s1853_s15 = smov 256   ;;  %s1854_s16 = smov 16  }
   0xd   :  { %32 = dma.hbm_to_vmem [thread:$0]  %s1989_s1, 61440, %s27_s13, [#allocation6], %s1853_s15, %s1853_s15, %s1854_s16  }
   0xe   :  { %s1855_s19 = smov [#allocation2]   ;;  %s1856_s21 = smov [#allocation7]  }
   0xf   :  { %s17_s20 = sshll.u32 %s1855_s19, 4  ;;  %s39_s22 = sshll.u32 %s1856_s21, 4  ;;  %s18_s20 = int_to_ptr.vmem [resolvable:$true] %s17_s20  ;;  %s40_s22 = int_to_ptr.vmem [resolvable:$true] %s39_s22 }
  0x10   :  { %s1794_s23 = scalar_lea.vmem %s18_s20, 128  ;;  %p1799_p6 = scmp.lt.s32.totalorder %s18_s20, %s18_s20 }
  0x11   :  { %p1795_p5 = scmp.ne.s32.totalorder %s18_s20, %s1794_s23  ;;  %p1800_p7 = scmp.lt.s32.totalorder %s1794_s23, %s1794_s23 }
  0x13   :  { %p1801_p8 = por %p1800_p7, %p1799_p6 }
  0x15   :  { %p1802_p9 = pnand %p1801_p8, %p1795_p5 }
  0x17   :  { %1805 = shalt.err (!%p1802_p9)
}
  0x18   :  { %20 = dma.hbm_to_vmem [thread:$0]  %s1988_s0, 128, %s18_s20, [#allocation3]  }
  0x19   :  { %s1814_s26 = scalar_lea.vmem %s40_s22, 256  ;;  %p1819_p11 = scmp.lt.s32.totalorder %s40_s22, %s40_s22 }
  0x1a   :  { %p1815_p10 = scmp.ne.s32.totalorder %s40_s22, %s1814_s26  ;;  %p1820_p12 = scmp.lt.s32.totalorder %s1814_s26, %s1814_s26 }
  0x1c   :  { %p1821_p13 = por %p1820_p12, %p1819_p11 }
  0x1e   :  { %p1822_p0 = pnand %p1821_p13, %p1815_p10 }
  0x20   :  { %1825 = shalt.err (!%p1822_p0)
}
  0x21   :  { %42 = dma.hbm_to_vmem [thread:$0]  %s1990_s2, 256, %s40_s22, [#allocation6]  }
  0x22   :  { %1846 = dma.done.wait [#allocation3], 128  }
  0x23   :  { %1847 = vsyncadd [#allocation3], 4294967168 }
  0x24   :  { %1848 = dma.done.wait [#allocation6], 61696  }
  0x25   :  { %1849 = vsyncadd [#allocation6], 4294905600  ;;  %v1857_v0 = vmov 0.0   ;;  %v86_v1 = vld [vmem:[#allocation5 + $0xf8] sm:$0xff]  ;;  %v85_v2 = vld [vmem:[#allocation5 + $0xf0] sm:$0xff]  ;;  %vm53_vm0 = vcmask 523264  }
  0x26   :  { %151 = vmatprep.mubr.f32.mxu0 %v1857_v0  ;;  %255 = vmatprep.mubr.f32.mxu1 %v1857_v0  ;;  %v84_v3 = vld [vmem:[#allocation5 + $0xe8] sm:$0xff]  ;;  %v83_v4 = vld [vmem:[#allocation5 + $0xe0] sm:$0xff]  ;;  %v82_v5 = vld [vmem:[#allocation5 + $0xd8] sm:$0xff]  ;;  %s1858_s0 = smov [#allocation8]   ;;  %vm1715_vm1 = vcmask 64512  }
  0x27   :  { %87 = vmatprep.subr.mxu0 %v86_v1  ;;  %v81_v6 = vld [vmem:[#allocation5 + $0xd0] sm:$0xff]  ;;  %v80_v7 = vld [vmem:[#allocation5 + $0xc8] sm:$0xff]  ;;  %v79_v8 = vld [vmem:[#allocation5 + $0xc0] sm:$0xff]  ;;  %s1723_s2 = sshll.u32 %s1858_s0, 4  ;;  %s1724_s2 = int_to_ptr.vmem [resolvable:$true] %s1723_s2 }
  0x28   :  { %88 = vmatpush1.msra.mxu0 %v85_v2  ;;  %v78_v9 = vld [vmem:[#allocation5 + $0xb8] sm:$0xff]  ;;  %v77_v10 = vld [vmem:[#allocation5 + $0xb0] sm:$0xff]  ;;  %v76_v11 = vld [vmem:[#allocation5 + $0xa8] sm:$0xff]  ;;  %s1826_s28 = scalar_lea.vmem %s1724_s2, 128  ;;  %p1831_p2 = scmp.lt.s32.totalorder %s1724_s2, %s1724_s2 }
  0x29   :  { %89 = vmatprep.subr.mxu0 %v84_v3  ;;  %v75_v12 = vld [vmem:[#allocation5 + $0xa0] sm:$0xff]  ;;  %v74_v13 = vld [vmem:[#allocation5 + $0x98] sm:$0xff]  ;;  %v73_v14 = vld [vmem:[#allocation5 + $0x90] sm:$0xff]  ;;  %p1827_p1 = scmp.ne.s32.totalorder %s1724_s2, %s1826_s28  ;;  %p1832_p3 = scmp.lt.s32.totalorder %s1826_s28, %s1826_s28 }
  0x2a   :  { %90 = vmatpush1.msra.mxu0 %v83_v4  ;;  %v1890_v15 = vld [vmem:[#allocation2] sm:$0xff]  ;;  %v189_v18 = vld [vmem:[#allocation5 + $0x1f0] sm:$0xff]  ;;  %v188_v19 = vld [vmem:[#allocation5 + $0x1e8] sm:$0xff] }
  0x2b   :  { %91 = vmatprep.subr.mxu0 %v82_v5  ;;  %v1894_v16 = vsel %vm53_vm0, %v1890_v15, 0.0  ;;  %v190_v17 = vld [vmem:[#allocation5 + $0x1f8] sm:$0xff]  ;;  %v72_v20 = vld [vmem:[#allocation5 + $0x88] sm:$0xff]  ;;  %v187_v21 = vld [vmem:[#allocation5 + $0x1e0] sm:$0xff]  ;;  %p1833_p4 = por %p1832_p3, %p1831_p2 }
  0x2c   :  { %92 = vmatpush1.msra.mxu0 %v81_v6  ;;  %191 = vmatprep.subr.mxu1 %v190_v17  ;;  %v71_v22 = vld [vmem:[#allocation5 + $0x80] sm:$0xff]  ;;  %v186_v23 = vld [vmem:[#allocation5 + $0x1d8] sm:$0xff]  ;;  %v185_v25 = vld [vmem:[#allocation5 + $0x1d0] sm:$0xff] }
  0x2d   :  { %93 = vmatprep.subr.mxu0 %v80_v7  ;;  %192 = vmatpush1.msra.mxu1 %v189_v18  ;;  %v70_v24 = vld [vmem:[#allocation5 + $0x78] sm:$0xff]  ;;  %v69_v26 = vld [vmem:[#allocation5 + $0x70] sm:$0xff]  ;;  %v184_v27 = vld [vmem:[#allocation5 + $0x1c8] sm:$0xff]  ;;  %p1834_p5 = pnand %p1833_p4, %p1827_p1 }
  0x2e   :  { %94 = vmatpush1.msra.mxu0 %v79_v8  ;;  %193 = vmatprep.subr.mxu1 %v188_v19  ;;  %v68_v28 = vld [vmem:[#allocation5 + $0x68] sm:$0xff]  ;;  %v183_v29 = vld [vmem:[#allocation5 + $0x1c0] sm:$0xff]  ;;  %v182_v31 = vld [vmem:[#allocation5 + $0x1b8] sm:$0xff] }
  0x2f   :  { %95 = vmatprep.subr.mxu0 %v78_v9  ;;  %194 = vmatpush1.msra.mxu1 %v187_v21  ;;  %v67_v30 = vld [vmem:[#allocation5 + $0x60] sm:$0xff]  ;;  %v66_v32 = vld [vmem:[#allocation5 + $0x58] sm:$0xff]  ;;  %v181_v33 = vld [vmem:[#allocation5 + $0x1b0] sm:$0xff] }
  0x30   :  { %96 = vmatpush1.msra.mxu0 %v77_v10  ;;  %195 = vmatprep.subr.mxu1 %v186_v23  ;;  %v65_v34 = vld [vmem:[#allocation5 + $0x50] sm:$0xff]  ;;  %v180_v35 = vld [vmem:[#allocation5 + $0x1a8] sm:$0xff]  ;;  %v179_v37 = vld [vmem:[#allocation5 + $0x1a0] sm:$0xff] }
  0x31   :  { %97 = vmatprep.subr.mxu0 %v76_v11  ;;  %196 = vmatpush1.msra.mxu1 %v185_v25  ;;  %v64_v36 = vld [vmem:[#allocation5 + $0x48] sm:$0xff]  ;;  %v63_v38 = vld [vmem:[#allocation5 + $0x40] sm:$0xff]  ;;  %v178_v39 = vld [vmem:[#allocation5 + $0x198] sm:$0xff] }
  0x32   :  { %98 = vmatpush1.msra.mxu0 %v75_v12  ;;  %197 = vmatprep.subr.mxu1 %v184_v27  ;;  %v62_v40 = vld [vmem:[#allocation5 + $0x38] sm:$0xff]  ;;  %v177_v41 = vld [vmem:[#allocation5 + $0x190] sm:$0xff]  ;;  %v176_v43 = vld [vmem:[#allocation5 + $0x188] sm:$0xff] }
  0x33   :  { %99 = vmatprep.subr.mxu0 %v74_v13  ;;  %198 = vmatpush1.msra.mxu1 %v183_v29  ;;  %v61_v42 = vld [vmem:[#allocation5 + $0x30] sm:$0xff]  ;;  %v60_v44 = vld [vmem:[#allocation5 + $0x28] sm:$0xff]  ;;  %v175_v45 = vld [vmem:[#allocation5 + $0x180] sm:$0xff] }
  0x34   :  { %100 = vmatpush1.msra.mxu0 %v73_v14  ;;  %199 = vmatprep.subr.mxu1 %v182_v31  ;;  %v59_v46 = vld [vmem:[#allocation5 + $0x20] sm:$0xff]  ;;  %v174_v47 = vld [vmem:[#allocation5 + $0x178] sm:$0xff]  ;;  %v173_v49 = vld [vmem:[#allocation5 + $0x170] sm:$0xff] }
  0x35   :  { %101 = vmatprep.subr.mxu0 %v72_v20  ;;  %200 = vmatpush1.msra.mxu1 %v181_v33  ;;  %v58_v48 = vld [vmem:[#allocation5 + $0x18] sm:$0xff]  ;;  %v57_v50 = vld [vmem:[#allocation5 + $0x10] sm:$0xff]  ;;  %v172_v51 = vld [vmem:[#allocation5 + $0x168] sm:$0xff] }
  0x36   :  { %102 = vmatpush1.msra.mxu0 %v71_v22  ;;  %201 = vmatprep.subr.mxu1 %v180_v35  ;;  %v56_v52 = vld [vmem:[#allocation5 + $0x8] sm:$0xff]  ;;  %v171_v53 = vld [vmem:[#allocation5 + $0x160] sm:$0xff]  ;;  %v170_v55 = vld [vmem:[#allocation5 + $0x158] sm:$0xff] }
  0x37   :  { %103 = vmatprep.subr.mxu0 %v70_v24  ;;  %202 = vmatpush1.msra.mxu1 %v179_v37  ;;  %v55_v54 = vld [vmem:[#allocation5] sm:$0xff]  ;;  %v169_v56 = vld [vmem:[#allocation5 + $0x150] sm:$0xff]  ;;  %v168_v57 = vld [vmem:[#allocation5 + $0x148] sm:$0xff] }
  0x38   :  { %104 = vmatpush1.msra.mxu0 %v69_v26  ;;  %203 = vmatprep.subr.mxu1 %v178_v39  ;;  %v167_v58 = vld [vmem:[#allocation5 + $0x140] sm:$0xff]  ;;  %v166_v59 = vld [vmem:[#allocation5 + $0x138] sm:$0xff]  ;;  %v165_v60 = vld [vmem:[#allocation5 + $0x130] sm:$0xff] }
  0x39   :  { %105 = vmatprep.subr.mxu0 %v68_v28  ;;  %204 = vmatpush1.msra.mxu1 %v177_v41  ;;  %v164_v61 = vld [vmem:[#allocation5 + $0x128] sm:$0xff]  ;;  %v163_v62 = vld [vmem:[#allocation5 + $0x120] sm:$0xff]  ;;  %v162_v63 = vld [vmem:[#allocation5 + $0x118] sm:$0xff] }
  0x3a   :  { %106 = vmatpush1.msra.mxu0 %v67_v30  ;;  %205 = vmatprep.subr.mxu1 %v176_v43  ;;  %v161_v1 = vld [vmem:[#allocation5 + $0x110] sm:$0xff]  ;;  %v160_v2 = vld [vmem:[#allocation5 + $0x108] sm:$0xff]  ;;  %v159_v3 = vld [vmem:[#allocation5 + $0x100] sm:$0xff] }
  0x3b   :  { %107 = vmatprep.subr.mxu0 %v66_v32  ;;  %206 = vmatpush1.msra.mxu1 %v175_v45  ;;  %v300_v7 = vld [vmem:[#allocation5 + $0x2f8] sm:$0xff]  ;;  %v299_v8 = vld [vmem:[#allocation5 + $0x2f0] sm:$0xff]  ;;  %v298_v9 = vld [vmem:[#allocation5 + $0x2e8] sm:$0xff] }
  0x3c   :  { %108 = vmatpush1.msra.mxu0 %v65_v34  ;;  %207 = vmatprep.subr.mxu1 %v174_v47  ;;  %v297_v10 = vld [vmem:[#allocation5 + $0x2e0] sm:$0xff]  ;;  %v296_v11 = vld [vmem:[#allocation5 + $0x2d8] sm:$0xff]  ;;  %v295_v12 = vld [vmem:[#allocation5 + $0x2d0] sm:$0xff] }
  0x3d   :  { %109 = vmatprep.subr.mxu0 %v64_v36  ;;  %208 = vmatpush1.msra.mxu1 %v173_v49  ;;  %v294_v13 = vld [vmem:[#allocation5 + $0x2c8] sm:$0xff]  ;;  %v293_v14 = vld [vmem:[#allocation5 + $0x2c0] sm:$0xff]  ;;  %v291_v17 = vld [vmem:[#allocation5 + $0x2b0] sm:$0xff] }
  0x3e   :  { %110 = vmatpush1.msra.mxu0 %v63_v38  ;;  %209 = vmatprep.subr.mxu1 %v172_v51  ;;  %v290_v18 = vld [vmem:[#allocation5 + $0x2a8] sm:$0xff]  ;;  %v289_v19 = vld [vmem:[#allocation5 + $0x2a0] sm:$0xff]  ;;  %v288_v20 = vld [vmem:[#allocation5 + $0x298] sm:$0xff] }
  0x3f   :  { %111 = vmatprep.subr.mxu0 %v62_v40  ;;  %210 = vmatpush1.msra.mxu1 %v171_v53  ;;  %v287_v21 = vld [vmem:[#allocation5 + $0x290] sm:$0xff]  ;;  %v286_v22 = vld [vmem:[#allocation5 + $0x288] sm:$0xff]  ;;  %v285_v23 = vld [vmem:[#allocation5 + $0x280] sm:$0xff] }
  0x40   :  { %112 = vmatpush1.msra.mxu0 %v61_v42  ;;  %211 = vmatprep.subr.mxu1 %v170_v55  ;;  %v284_v24 = vld [vmem:[#allocation5 + $0x278] sm:$0xff]  ;;  %v283_v25 = vld [vmem:[#allocation5 + $0x270] sm:$0xff]  ;;  %v282_v26 = vld [vmem:[#allocation5 + $0x268] sm:$0xff] }
  0x41   :  { %113 = vmatprep.subr.mxu0 %v60_v44  ;;  %212 = vmatpush1.msra.mxu1 %v169_v56  ;;  %v281_v27 = vld [vmem:[#allocation5 + $0x260] sm:$0xff]  ;;  %v280_v28 = vld [vmem:[#allocation5 + $0x258] sm:$0xff]  ;;  %v279_v29 = vld [vmem:[#allocation5 + $0x250] sm:$0xff] }
  0x42   :  { %114 = vmatpush1.msra.mxu0 %v59_v46  ;;  %213 = vmatprep.subr.mxu1 %v168_v57  ;;  %v278_v30 = vld [vmem:[#allocation5 + $0x248] sm:$0xff]  ;;  %v277_v31 = vld [vmem:[#allocation5 + $0x240] sm:$0xff]  ;;  %v276_v32 = vld [vmem:[#allocation5 + $0x238] sm:$0xff] }
  0x43   :  { %115 = vmatprep.subr.mxu0 %v58_v48  ;;  %214 = vmatpush1.msra.mxu1 %v167_v58  ;;  %v275_v33 = vld [vmem:[#allocation5 + $0x230] sm:$0xff]  ;;  %v274_v34 = vld [vmem:[#allocation5 + $0x228] sm:$0xff]  ;;  %v273_v35 = vld [vmem:[#allocation5 + $0x220] sm:$0xff] }
  0x44   :  { %116 = vmatpush1.msra.mxu0 %v57_v50  ;;  %215 = vmatprep.subr.mxu1 %v166_v59  ;;  %v272_v36 = vld [vmem:[#allocation5 + $0x218] sm:$0xff]  ;;  %v271_v37 = vld [vmem:[#allocation5 + $0x210] sm:$0xff]  ;;  %v270_v38 = vld [vmem:[#allocation5 + $0x208] sm:$0xff] }
  0x45   :  { %117 = vmatprep.subr.mxu0 %v56_v52  ;;  %216 = vmatpush1.msra.mxu1 %v165_v60  ;;  %v269_v39 = vld [vmem:[#allocation5 + $0x200] sm:$0xff]  ;;  %v418_v40 = vld [vmem:[#allocation5 + $0x3f8] sm:$0xff]  ;;  %v417_v41 = vld [vmem:[#allocation5 + $0x3f0] sm:$0xff] }
  0x46   :  { %118 = vmatpush1.msra.mxu0 %v55_v54  ;;  %217 = vmatprep.subr.mxu1 %v164_v61  ;;  %v416_v42 = vld [vmem:[#allocation5 + $0x3e8] sm:$0xff]  ;;  %v415_v43 = vld [vmem:[#allocation5 + $0x3e0] sm:$0xff]  ;;  %v414_v44 = vld [vmem:[#allocation5 + $0x3d8] sm:$0xff] }
  0x47   :  { %1733 = vmatmul.mubr.msk.f32.vlgmr.msra.gmra.mxu0 %vm53_vm0, %v1890_v15  ;;  %218 = vmatpush1.msra.mxu1 %v163_v62  ;;  %v292_v15 = vld [vmem:[#allocation5 + $0x2b8] sm:$0xff]  ;;  %v413_v45 = vld [vmem:[#allocation5 + $0x3d0] sm:$0xff]  ;;  %v412_v46 = vld [vmem:[#allocation5 + $0x3c8] sm:$0xff] }
  0x48   :  { %377 = vmatprep.mubr.f32.mxu0 %v1857_v0  ;;  %219 = vmatprep.subr.mxu1 %v162_v63  ;;  %v411_v47 = vld [vmem:[#allocation5 + $0x3c0] sm:$0xff]  ;;  %v410_v48 = vld [vmem:[#allocation5 + $0x3b8] sm:$0xff]  ;;  %v409_v49 = vld [vmem:[#allocation5 + $0x3b0] sm:$0xff] }
  0x49   :  { %220 = vmatpush1.msra.mxu1 %v161_v1  ;;  %313 = vmatprep.subr.mxu0 %v300_v7  ;;  %v408_v50 = vld [vmem:[#allocation5 + $0x3a8] sm:$0xff]  ;;  %v407_v51 = vld [vmem:[#allocation5 + $0x3a0] sm:$0xff]  ;;  %v406_v52 = vld [vmem:[#allocation5 + $0x398] sm:$0xff] }
  0x4a   :  { %221 = vmatprep.subr.mxu1 %v160_v2  ;;  %314 = vmatpush1.msra.mxu0 %v299_v8  ;;  %v405_v53 = vld [vmem:[#allocation5 + $0x390] sm:$0xff]  ;;  %v404_v54 = vld [vmem:[#allocation5 + $0x388] sm:$0xff]  ;;  %v403_v55 = vld [vmem:[#allocation5 + $0x380] sm:$0xff] }
  0x4b   :  { %222 = vmatpush1.msra.mxu1 %v159_v3  ;;  %315 = vmatprep.subr.mxu0 %v298_v9  ;;  %v402_v56 = vld [vmem:[#allocation5 + $0x378] sm:$0xff]  ;;  %v401_v57 = vld [vmem:[#allocation5 + $0x370] sm:$0xff]  ;;  %v400_v58 = vld [vmem:[#allocation5 + $0x368] sm:$0xff] }
  0x4c   :  { %316 = vmatpush1.msra.mxu0 %v297_v10  ;;  %419 = vmatprep.subr.mxu1 %v418_v40  ;;  %v399_v59 = vld [vmem:[#allocation5 + $0x360] sm:$0xff]  ;;  %v398_v60 = vld [vmem:[#allocation5 + $0x358] sm:$0xff]  ;;  %v397_v61 = vld [vmem:[#allocation5 + $0x350] sm:$0xff] }
  0x4d   :  { %317 = vmatprep.subr.mxu0 %v296_v11  ;;  %v396_v62 = vld [vmem:[#allocation5 + $0x348] sm:$0xff]  ;;  %v395_v63 = vld [vmem:[#allocation5 + $0x340] sm:$0xff]  ;;  %v394_v1 = vld [vmem:[#allocation5 + $0x338] sm:$0xff] }
  0x4e   :  { %318 = vmatpush1.msra.mxu0 %v295_v12  ;;  %v393_v9 = vld [vmem:[#allocation5 + $0x330] sm:$0xff]  ;;  %v392_v10 = vld [vmem:[#allocation5 + $0x328] sm:$0xff]  ;;  %v391_v11 = vld [vmem:[#allocation5 + $0x320] sm:$0xff] }
  0x4f   :  { %319 = vmatprep.subr.mxu0 %v294_v13  ;;  %v390_v12 = vld [vmem:[#allocation5 + $0x318] sm:$0xff]  ;;  %v389_v13 = vld [vmem:[#allocation5 + $0x310] sm:$0xff] }
  0x50   :  { %320 = vmatpush1.msra.mxu0 %v293_v14  ;;  %v388_v14 = vld [vmem:[#allocation5 + $0x308] sm:$0xff]  ;;  %v498_v40 = vld [vmem:[#allocation5 + $0x438] sm:$0xff] }
  0x51   :  { %321 = vmatprep.subr.mxu0 %v292_v15  ;;  %v387_v15 = vld [vmem:[#allocation5 + $0x300] sm:$0xff] }
  0x52   :  { %322 = vmatpush1.msra.mxu0 %v291_v17  ;;  %v522_v17 = vld [vmem:[#allocation5 + $0x4f8] sm:$0xff] }
  0x53   :  { %323 = vmatprep.subr.mxu0 %v290_v18  ;;  %v521_v18 = vld [vmem:[#allocation5 + $0x4f0] sm:$0xff] }
  0x54   :  { %324 = vmatpush1.msra.mxu0 %v289_v19  ;;  %v519_v19 = vld [vmem:[#allocation5 + $0x4e0] sm:$0xff] }
  0x55   :  { %325 = vmatprep.subr.mxu0 %v288_v20  ;;  %v518_v20 = vld [vmem:[#allocation5 + $0x4d8] sm:$0xff] }
  0x56   :  { %326 = vmatpush1.msra.mxu0 %v287_v21  ;;  %v517_v21 = vld [vmem:[#allocation5 + $0x4d0] sm:$0xff] }
  0x57   :  { %327 = vmatprep.subr.mxu0 %v286_v22  ;;  %v516_v22 = vld [vmem:[#allocation5 + $0x4c8] sm:$0xff] }
  0x58   :  { %328 = vmatpush1.msra.mxu0 %v285_v23  ;;  %v515_v23 = vld [vmem:[#allocation5 + $0x4c0] sm:$0xff] }
  0x59   :  { %329 = vmatprep.subr.mxu0 %v284_v24  ;;  %v514_v24 = vld [vmem:[#allocation5 + $0x4b8] sm:$0xff] }
  0x5a   :  { %330 = vmatpush1.msra.mxu0 %v283_v25  ;;  %v513_v25 = vld [vmem:[#allocation5 + $0x4b0] sm:$0xff] }
  0x5b   :  { %331 = vmatprep.subr.mxu0 %v282_v26  ;;  %v512_v26 = vld [vmem:[#allocation5 + $0x4a8] sm:$0xff] }
  0x5c   :  { %332 = vmatpush1.msra.mxu0 %v281_v27  ;;  %v511_v27 = vld [vmem:[#allocation5 + $0x4a0] sm:$0xff] }
  0x5d   :  { %333 = vmatprep.subr.mxu0 %v280_v28  ;;  %v510_v28 = vld [vmem:[#allocation5 + $0x498] sm:$0xff] }
  0x5e   :  { %334 = vmatpush1.msra.mxu0 %v279_v29  ;;  %v509_v29 = vld [vmem:[#allocation5 + $0x490] sm:$0xff] }
  0x5f   :  { %335 = vmatprep.subr.mxu0 %v278_v30  ;;  %v508_v30 = vld [vmem:[#allocation5 + $0x488] sm:$0xff] }
  0x60   :  { %336 = vmatpush1.msra.mxu0 %v277_v31  ;;  %v507_v31 = vld [vmem:[#allocation5 + $0x480] sm:$0xff] }
  0x61   :  { %337 = vmatprep.subr.mxu0 %v276_v32  ;;  %v506_v32 = vld [vmem:[#allocation5 + $0x478] sm:$0xff] }
  0x62   :  { %338 = vmatpush1.msra.mxu0 %v275_v33  ;;  %v505_v33 = vld [vmem:[#allocation5 + $0x470] sm:$0xff] }
  0x63   :  { %339 = vmatprep.subr.mxu0 %v274_v34  ;;  %v504_v34 = vld [vmem:[#allocation5 + $0x468] sm:$0xff] }
  0x64   :  { %340 = vmatpush1.msra.mxu0 %v273_v35  ;;  %v503_v35 = vld [vmem:[#allocation5 + $0x460] sm:$0xff] }
  0x65   :  { %341 = vmatprep.subr.mxu0 %v272_v36  ;;  %v502_v36 = vld [vmem:[#allocation5 + $0x458] sm:$0xff] }
  0x66   :  { %342 = vmatpush1.msra.mxu0 %v271_v37  ;;  %v501_v37 = vld [vmem:[#allocation5 + $0x450] sm:$0xff] }
  0x67   :  { %343 = vmatprep.subr.mxu0 %v270_v38  ;;  %v500_v38 = vld [vmem:[#allocation5 + $0x448] sm:$0xff] }
  0x68   :  { %344 = vmatpush1.msra.mxu0 %v269_v39  ;;  %v499_v39 = vld [vmem:[#allocation5 + $0x440] sm:$0xff] }
  0x69   :  { %523 = vmatprep.subr.mxu0 %v522_v17  ;;  %v614_v17 = vld [vmem:[#allocation5 + $0x560] sm:$0xff] }
 0x107   :  { %v153_v4 = vpop.f32.mrf.mxu0 }
 0x108   :  { %v157_v5 = vmax.f32 %v153_v4, 0.0 }
 0x109   :  { %v155_v6 = vpop.f32.mrf.mxu0 }
 0x10a   :  { %256 = vmatmul.mubr.f32.vlgmr.msra.gmra.mxu1 %v157_v5 }
 0x10b   :  { %483 = vmatprep.mubr.f32.mxu1 %v1857_v0  ;;  %420 = vmatpush1.msra.mxu1 %v417_v41  ;;  %v497_v41 = vld [vmem:[#allocation5 + $0x430] sm:$0xff] }
 0x10c   :  { %421 = vmatprep.subr.mxu1 %v416_v42  ;;  %v496_v42 = vld [vmem:[#allocation5 + $0x428] sm:$0xff] }
 0x10d   :  { %422 = vmatpush1.msra.mxu1 %v415_v43  ;;  %v495_v43 = vld [vmem:[#allocation5 + $0x420] sm:$0xff] }
 0x10e   :  { %423 = vmatprep.subr.mxu1 %v414_v44  ;;  %v494_v44 = vld [vmem:[#allocation5 + $0x418] sm:$0xff] }
 0x10f   :  { %424 = vmatpush1.msra.mxu1 %v413_v45  ;;  %v303_v45 = vlaneseq }
 0x110   :  { %425 = vmatprep.subr.mxu1 %v412_v46 }
 0x111   :  { %426 = vmatpush1.msra.mxu1 %v411_v47  ;;  %v1902_v46 = vshrl.u32 %v303_v45, 7  ;;  %v736_v45 = vld [vmem:[#allocation5 + $0x678] sm:$0xff] }
 0x112   :  { %427 = vmatprep.subr.mxu1 %v410_v48  ;;  %v1907_v48 = vld [vmem:[#allocation7] ss:$8 sm:$0x3] }
 0x113   :  { %428 = vmatpush1.msra.mxu1 %v409_v49  ;;  %v1905_v47 = vsub.s32 1, %v1902_v46 }
 0x114   :  { %429 = vmatprep.subr.mxu1 %v408_v50 }
 0x115   :  { %430 = vmatpush1.msra.mxu1 %v407_v51  ;;  %v310_v49 = vrot.slane %v1907_v48, %v1905_v47 }
 0x116   :  { %431 = vmatprep.subr.mxu1 %v406_v52 }
 0x117   :  { %432 = vmatpush1.msra.mxu1 %v405_v53 }
 0x118   :  { %433 = vmatprep.subr.mxu1 %v404_v54  ;;  %v493_v54 = vld [vmem:[#allocation5 + $0x410] sm:$0xff] }
 0x119   :  { %434 = vmatpush1.msra.mxu1 %v403_v55  ;;  %v492_v55 = vld [vmem:[#allocation5 + $0x408] sm:$0xff] }
 0x11a   :  { %435 = vmatprep.subr.mxu1 %v402_v56  ;;  %v491_v56 = vld [vmem:[#allocation5 + $0x400] sm:$0xff] }
 0x11b   :  { %436 = vmatpush1.msra.mxu1 %v401_v57 }
 0x11c   :  { %437 = vmatprep.subr.mxu1 %v400_v58 }
 0x11d   :  { %438 = vmatpush1.msra.mxu1 %v399_v59 }
 0x11e   :  { %439 = vmatprep.subr.mxu1 %v398_v60  ;;  %v633_v60 = vld [vmem:[#allocation5 + $0x5f8] sm:$0xff] }
 0x11f   :  { %440 = vmatpush1.msra.mxu1 %v397_v61  ;;  %v632_v61 = vld [vmem:[#allocation5 + $0x5f0] sm:$0xff] }
 0x120   :  { %441 = vmatprep.subr.mxu1 %v396_v62  ;;  %v631_v62 = vld [vmem:[#allocation5 + $0x5e8] sm:$0xff] }
 0x121   :  { %442 = vmatpush1.msra.mxu1 %v395_v63  ;;  %v630_v63 = vld [vmem:[#allocation5 + $0x5e0] sm:$0xff] }
 0x122   :  { %443 = vmatprep.subr.mxu1 %v394_v1  ;;  %v629_v1 = vld [vmem:[#allocation5 + $0x5d8] sm:$0xff] }
 0x123   :  { %444 = vmatpush1.msra.mxu1 %v393_v9  ;;  %v621_v9 = vld [vmem:[#allocation5 + $0x598] sm:$0xff] }
 0x124   :  { %445 = vmatprep.subr.mxu1 %v392_v10  ;;  %v620_v10 = vld [vmem:[#allocation5 + $0x590] sm:$0xff] }
 0x125   :  { %446 = vmatpush1.msra.mxu1 %v391_v11  ;;  %v619_v11 = vld [vmem:[#allocation5 + $0x588] sm:$0xff] }
 0x126   :  { %447 = vmatprep.subr.mxu1 %v390_v12  ;;  %v618_v12 = vld [vmem:[#allocation5 + $0x580] sm:$0xff] }
 0x127   :  { %448 = vmatpush1.msra.mxu1 %v389_v13  ;;  %v617_v13 = vld [vmem:[#allocation5 + $0x578] sm:$0xff] }
 0x128   :  { %449 = vmatprep.subr.mxu1 %v388_v14  ;;  %v616_v14 = vld [vmem:[#allocation5 + $0x570] sm:$0xff] }
 0x129   :  { %450 = vmatpush1.msra.mxu1 %v387_v15  ;;  %v615_v15 = vld [vmem:[#allocation5 + $0x568] sm:$0xff] }
 0x12a   :  { %647 = vmatprep.subr.mxu1 %v633_v60 }
 0x1ca   :  { %v257_v2 = vpop.f32.mrf.mxu1 }
 0x1cb   :  { %v1734_v3 = vmul.f32 -1.442695, %v257_v2  ;;  %v628_v2 = vld [vmem:[#allocation5 + $0x5d0] sm:$0xff] }
 0x1cc   :  { %v259_v4 = vpop.f32.mrf.mxu1 }
 0x1cd   :  { %1746 = vpow2.f32 %v1734_v3  ;;  %v627_v3 = vld [vmem:[#allocation5 + $0x5c8] sm:$0xff]  ;;  %v626_v4 = vld [vmem:[#allocation5 + $0x5c0] sm:$0xff] }
 0x1da   :  { %v1747_v5 = vpop.eup %1746 }
 0x1db   :  { %v264_v6 = vadd.f32 1.0, %v1747_v5  ;;  %v625_v5 = vld [vmem:[#allocation5 + $0x5b8] sm:$0xff] }
 0x1dd   :  { %1748 = vrcp.f32 %v264_v6  ;;  %v624_v6 = vld [vmem:[#allocation5 + $0x5b0] sm:$0xff] }
 0x1ea   :  { %v1749_v7 = vpop.eup %1748 }
 0x1eb   :  { %v267_v8 = vmul.f32 %v1749_v7, %v1894_v16  ;;  %v520_v16 = vld [vmem:[#allocation5 + $0x4e8] sm:$0xff] }
 0x1ec   :  { %v623_v7 = vld [vmem:[#allocation5 + $0x5a8] sm:$0xff] }
 0x1ed   :  { %378 = vmatmul.mubr.f32.vlgmr.msra.gmra.mxu0 %v267_v8  ;;  %v622_v8 = vld [vmem:[#allocation5 + $0x5a0] sm:$0xff] }
 0x1ee   :  { %587 = vmatprep.mubr.f32.mxu0 %v1857_v0  ;;  %524 = vmatpush1.msra.mxu0 %v521_v18  ;;  %v613_v18 = vld [vmem:[#allocation5 + $0x558] sm:$0xff] }
 0x1ef   :  { %525 = vmatprep.subr.mxu0 %v520_v16  ;;  %v612_v16 = vld [vmem:[#allocation5 + $0x550] sm:$0xff] }
 0x1f0   :  { %526 = vmatpush1.msra.mxu0 %v519_v19  ;;  %v611_v19 = vld [vmem:[#allocation5 + $0x548] sm:$0xff] }
 0x1f1   :  { %527 = vmatprep.subr.mxu0 %v518_v20  ;;  %v610_v20 = vld [vmem:[#allocation5 + $0x540] sm:$0xff] }
 0x1f2   :  { %528 = vmatpush1.msra.mxu0 %v517_v21  ;;  %v609_v21 = vld [vmem:[#allocation5 + $0x538] sm:$0xff] }
 0x1f3   :  { %529 = vmatprep.subr.mxu0 %v516_v22  ;;  %v608_v22 = vld [vmem:[#allocation5 + $0x530] sm:$0xff] }
 0x1f4   :  { %530 = vmatpush1.msra.mxu0 %v515_v23  ;;  %v607_v23 = vld [vmem:[#allocation5 + $0x528] sm:$0xff] }
 0x1f5   :  { %531 = vmatprep.subr.mxu0 %v514_v24  ;;  %v606_v24 = vld [vmem:[#allocation5 + $0x520] sm:$0xff] }
 0x1f6   :  { %532 = vmatpush1.msra.mxu0 %v513_v25  ;;  %v605_v25 = vld [vmem:[#allocation5 + $0x518] sm:$0xff] }
 0x1f7   :  { %533 = vmatprep.subr.mxu0 %v512_v26  ;;  %v604_v26 = vld [vmem:[#allocation5 + $0x510] sm:$0xff] }
 0x1f8   :  { %534 = vmatpush1.msra.mxu0 %v511_v27  ;;  %v603_v27 = vld [vmem:[#allocation5 + $0x508] sm:$0xff] }
 0x1f9   :  { %535 = vmatprep.subr.mxu0 %v510_v28  ;;  %v602_v28 = vld [vmem:[#allocation5 + $0x500] sm:$0xff] }
 0x1fa   :  { %536 = vmatpush1.msra.mxu0 %v509_v29  ;;  %v752_v29 = vld [vmem:[#allocation5 + $0x6f8] sm:$0xff] }
 0x1fb   :  { %537 = vmatprep.subr.mxu0 %v508_v30  ;;  %v751_v30 = vld [vmem:[#allocation5 + $0x6f0] sm:$0xff] }
 0x1fc   :  { %538 = vmatpush1.msra.mxu0 %v507_v31  ;;  %v750_v31 = vld [vmem:[#allocation5 + $0x6e8] sm:$0xff] }
 0x1fd   :  { %539 = vmatprep.subr.mxu0 %v506_v32  ;;  %v749_v32 = vld [vmem:[#allocation5 + $0x6e0] sm:$0xff] }
 0x1fe   :  { %540 = vmatpush1.msra.mxu0 %v505_v33  ;;  %v748_v33 = vld [vmem:[#allocation5 + $0x6d8] sm:$0xff] }
 0x1ff   :  { %541 = vmatprep.subr.mxu0 %v504_v34  ;;  %v747_v34 = vld [vmem:[#allocation5 + $0x6d0] sm:$0xff] }
 0x200   :  { %542 = vmatpush1.msra.mxu0 %v503_v35  ;;  %v746_v35 = vld [vmem:[#allocation5 + $0x6c8] sm:$0xff] }
 0x201   :  { %543 = vmatprep.subr.mxu0 %v502_v36  ;;  %v745_v36 = vld [vmem:[#allocation5 + $0x6c0] sm:$0xff] }
 0x202   :  { %544 = vmatpush1.msra.mxu0 %v501_v37  ;;  %v744_v37 = vld [vmem:[#allocation5 + $0x6b8] sm:$0xff] }
 0x203   :  { %545 = vmatprep.subr.mxu0 %v500_v38  ;;  %v743_v38 = vld [vmem:[#allocation5 + $0x6b0] sm:$0xff] }
 0x204   :  { %546 = vmatpush1.msra.mxu0 %v499_v39  ;;  %v742_v39 = vld [vmem:[#allocation5 + $0x6a8] sm:$0xff] }
 0x205   :  { %547 = vmatprep.subr.mxu0 %v498_v40  ;;  %v741_v40 = vld [vmem:[#allocation5 + $0x6a0] sm:$0xff] }
 0x206   :  { %548 = vmatpush1.msra.mxu0 %v497_v41  ;;  %v740_v41 = vld [vmem:[#allocation5 + $0x698] sm:$0xff] }
 0x207   :  { %549 = vmatprep.subr.mxu0 %v496_v42  ;;  %v739_v42 = vld [vmem:[#allocation5 + $0x690] sm:$0xff] }
 0x208   :  { %550 = vmatpush1.msra.mxu0 %v495_v43  ;;  %v738_v43 = vld [vmem:[#allocation5 + $0x688] sm:$0xff] }
 0x209   :  { %551 = vmatprep.subr.mxu0 %v494_v44  ;;  %v737_v44 = vld [vmem:[#allocation5 + $0x680] sm:$0xff] }
 0x20a   :  { %552 = vmatpush1.msra.mxu0 %v493_v54  ;;  %v733_v54 = vld [vmem:[#allocation5 + $0x660] sm:$0xff] }
 0x20b   :  { %553 = vmatprep.subr.mxu0 %v492_v55  ;;  %v732_v55 = vld [vmem:[#allocation5 + $0x658] sm:$0xff] }
 0x20c   :  { %554 = vmatpush1.msra.mxu0 %v491_v56  ;;  %v731_v56 = vld [vmem:[#allocation5 + $0x650] sm:$0xff] }
 0x20d   :  { %753 = vmatprep.subr.mxu0 %v752_v29  ;;  %v838_v29 = vld [vmem:[#allocation5 + $0x768] sm:$0xff] }
 0x2ad   :  { %v1911_v50 = vpop.f32.mrf.mxu0 }
 0x2af   :  { %v381_v51 = vpop.f32.mrf.mxu0 }
 0x2b0   :  { %v1913_v52 = vadd.f32 %v381_v51, %v310_v49  ;;  %v735_v49 = vld [vmem:[#allocation5 + $0x670] sm:$0xff]  ;;  %v734_v51 = vld [vmem:[#allocation5 + $0x668] sm:$0xff] }
 0x2b2   :  { %v385_v53 = vmax.f32 %v1913_v52, 0.0  ;;  %v856_v52 = vld [vmem:[#allocation5 + $0x7f8] sm:$0xff] }
 0x2b4   :  { %484 = vmatmul.mubr.f32.vlgmr.msra.gmra.mxu1 %v385_v53 }
 0x2b5   :  { %711 = vmatprep.mubr.f32.mxu1 %v1857_v0  ;;  %648 = vmatpush1.msra.mxu1 %v632_v61 }
 0x2b6   :  { %649 = vmatprep.subr.mxu1 %v631_v62 }
 0x2b7   :  { %650 = vmatpush1.msra.mxu1 %v630_v63 }
 0x2b8   :  { %651 = vmatprep.subr.mxu1 %v629_v1 }
 0x2b9   :  { %652 = vmatpush1.msra.mxu1 %v628_v2  ;;  %v1921_v2 = vsub.s32 0, %v1902_v46  ;;  %v725_v46 = vld [vmem:[#allocation5 + $0x620] sm:$0xff] }
 0x2ba   :  { %653 = vmatprep.subr.mxu1 %v627_v3 }
 0x2bb   :  { %654 = vmatpush1.msra.mxu1 %v626_v4  ;;  %v306_v3 = vrot.slane %v1907_v48, %v1921_v2  ;;  %v723_v48 = vld [vmem:[#allocation5 + $0x610] sm:$0xff] }
 0x2bc   :  { %655 = vmatprep.subr.mxu1 %v625_v5 }
 0x2bd   :  { %656 = vmatpush1.msra.mxu1 %v624_v6  ;;  %v380_v4 = vadd.f32 %v1911_v50, %v306_v3  ;;  %v722_v50 = vld [vmem:[#allocation5 + $0x608] sm:$0xff]  ;;  %v960_v3 = vld [vmem:[#allocation5 + $0x8c0] sm:$0xff] }
 0x2be   :  { %657 = vmatprep.subr.mxu1 %v623_v7 }
 0x2bf   :  { %658 = vmatpush1.msra.mxu1 %v622_v8  ;;  %v384_v6 = vmax.f32 %v380_v4, 0.0  ;;  %v959_v4 = vld [vmem:[#allocation5 + $0x8b8] sm:$0xff] }
 0x2c0   :  { %659 = vmatprep.subr.mxu1 %v621_v9  ;;  %v727_v9 = vld [vmem:[#allocation5 + $0x630] sm:$0xff] }
 0x2c1   :  { %660 = vmatpush1.msra.mxu1 %v620_v10  ;;  %v726_v10 = vld [vmem:[#allocation5 + $0x628] sm:$0xff] }
 0x2c2   :  { %661 = vmatprep.subr.mxu1 %v619_v11  ;;  %v724_v11 = vld [vmem:[#allocation5 + $0x618] sm:$0xff] }
 0x2c3   :  { %662 = vmatpush1.msra.mxu1 %v618_v12  ;;  %v721_v12 = vld [vmem:[#allocation5 + $0x600] sm:$0xff] }
 0x2c4   :  { %663 = vmatprep.subr.mxu1 %v617_v13  ;;  %v854_v13 = vld [vmem:[#allocation5 + $0x7e8] sm:$0xff] }
 0x2c5   :  { %664 = vmatpush1.msra.mxu1 %v616_v14  ;;  %v853_v14 = vld [vmem:[#allocation5 + $0x7e0] sm:$0xff] }
 0x2c6   :  { %665 = vmatprep.subr.mxu1 %v615_v15  ;;  %v852_v15 = vld [vmem:[#allocation5 + $0x7d8] sm:$0xff] }
 0x2c7   :  { %666 = vmatpush1.msra.mxu1 %v614_v17  ;;  %v851_v17 = vld [vmem:[#allocation5 + $0x7d0] sm:$0xff] }
 0x2c8   :  { %667 = vmatprep.subr.mxu1 %v613_v18  ;;  %v850_v18 = vld [vmem:[#allocation5 + $0x7c8] sm:$0xff] }
 0x2c9   :  { %668 = vmatpush1.msra.mxu1 %v612_v16  ;;  %v849_v16 = vld [vmem:[#allocation5 + $0x7c0] sm:$0xff] }
 0x2ca   :  { %669 = vmatprep.subr.mxu1 %v611_v19  ;;  %v848_v19 = vld [vmem:[#allocation5 + $0x7b8] sm:$0xff] }
 0x2cb   :  { %670 = vmatpush1.msra.mxu1 %v610_v20  ;;  %v847_v20 = vld [vmem:[#allocation5 + $0x7b0] sm:$0xff] }
 0x2cc   :  { %671 = vmatprep.subr.mxu1 %v609_v21  ;;  %v846_v21 = vld [vmem:[#allocation5 + $0x7a8] sm:$0xff] }
 0x2cd   :  { %672 = vmatpush1.msra.mxu1 %v608_v22  ;;  %v845_v22 = vld [vmem:[#allocation5 + $0x7a0] sm:$0xff] }
 0x2ce   :  { %673 = vmatprep.subr.mxu1 %v607_v23  ;;  %v844_v23 = vld [vmem:[#allocation5 + $0x798] sm:$0xff] }
 0x2cf   :  { %674 = vmatpush1.msra.mxu1 %v606_v24  ;;  %v843_v24 = vld [vmem:[#allocation5 + $0x790] sm:$0xff] }
 0x2d0   :  { %675 = vmatprep.subr.mxu1 %v605_v25  ;;  %v842_v25 = vld [vmem:[#allocation5 + $0x788] sm:$0xff] }
 0x2d1   :  { %676 = vmatpush1.msra.mxu1 %v604_v26  ;;  %v841_v26 = vld [vmem:[#allocation5 + $0x780] sm:$0xff] }
 0x2d2   :  { %677 = vmatprep.subr.mxu1 %v603_v27  ;;  %v840_v27 = vld [vmem:[#allocation5 + $0x778] sm:$0xff] }
 0x2d3   :  { %678 = vmatpush1.msra.mxu1 %v602_v28  ;;  %v839_v28 = vld [vmem:[#allocation5 + $0x770] sm:$0xff] }
 0x2d4   :  { %857 = vmatprep.subr.mxu1 %v856_v52  ;;  %v947_v52 = vld [vmem:[#allocation5 + $0x858] sm:$0xff] }
 0x374   :  { %v485_v57 = vpop.f32.mrf.mxu1 }
 0x375   :  { %v489_v58 = vmax.f32 %v485_v57, 0.0  ;;  %v730_v57 = vld [vmem:[#allocation5 + $0x648] sm:$0xff] }
 0x376   :  { %v487_v59 = vpop.f32.mrf.mxu1 }
 0x377   :  { %588 = vmatmul.mubr.f32.vlgmr.msra.gmra.mxu0 %v489_v58  ;;  %v729_v58 = vld [vmem:[#allocation5 + $0x640] sm:$0xff]  ;;  %v728_v59 = vld [vmem:[#allocation5 + $0x638] sm:$0xff] }
 0x378   :  { %817 = vmatprep.mubr.f32.mxu0 %v1857_v0  ;;  %754 = vmatpush1.msra.mxu0 %v751_v30  ;;  %v837_v30 = vld [vmem:[#allocation5 + $0x760] sm:$0xff] }
 0x379   :  { %755 = vmatprep.subr.mxu0 %v750_v31  ;;  %v836_v31 = vld [vmem:[#allocation5 + $0x758] sm:$0xff] }
 0x37a   :  { %756 = vmatpush1.msra.mxu0 %v749_v32  ;;  %v835_v32 = vld [vmem:[#allocation5 + $0x750] sm:$0xff] }
 0x37b   :  { %757 = vmatprep.subr.mxu0 %v748_v33  ;;  %v834_v33 = vld [vmem:[#allocation5 + $0x748] sm:$0xff] }
 0x37c   :  { %758 = vmatpush1.msra.mxu0 %v747_v34  ;;  %v833_v34 = vld [vmem:[#allocation5 + $0x740] sm:$0xff] }
 0x37d   :  { %759 = vmatprep.subr.mxu0 %v746_v35  ;;  %v832_v35 = vld [vmem:[#allocation5 + $0x738] sm:$0xff] }
 0x37e   :  { %760 = vmatpush1.msra.mxu0 %v745_v36  ;;  %v831_v36 = vld [vmem:[#allocation5 + $0x730] sm:$0xff] }
 0x37f   :  { %761 = vmatprep.subr.mxu0 %v744_v37  ;;  %v830_v37 = vld [vmem:[#allocation5 + $0x728] sm:$0xff] }
 0x380   :  { %762 = vmatpush1.msra.mxu0 %v743_v38  ;;  %v829_v38 = vld [vmem:[#allocation5 + $0x720] sm:$0xff] }
 0x381   :  { %763 = vmatprep.subr.mxu0 %v742_v39  ;;  %v828_v39 = vld [vmem:[#allocation5 + $0x718] sm:$0xff] }
 0x382   :  { %764 = vmatpush1.msra.mxu0 %v741_v40  ;;  %v1929_v40 = vld [vmem:[#allocation7 + $0x1] ss:$8 sm:$0x3] }
 0x383   :  { %765 = vmatprep.subr.mxu0 %v740_v41  ;;  %v644_v41 = vrot.slane %v1929_v40, %v1905_v47 }
 0x384   :  { %766 = vmatpush1.msra.mxu0 %v739_v42 }
 0x385   :  { %767 = vmatprep.subr.mxu0 %v738_v43 }
 0x386   :  { %768 = vmatpush1.msra.mxu0 %v737_v44 }
 0x387   :  { %769 = vmatprep.subr.mxu0 %v736_v45 }
 0x388   :  { %770 = vmatpush1.msra.mxu0 %v735_v49  ;;  %v827_v49 = vld [vmem:[#allocation5 + $0x710] sm:$0xff] }
 0x389   :  { %771 = vmatprep.subr.mxu0 %v734_v51  ;;  %v826_v51 = vld [vmem:[#allocation5 + $0x708] sm:$0xff] }
 0x38a   :  { %772 = vmatpush1.msra.mxu0 %v733_v54  ;;  %v825_v54 = vld [vmem:[#allocation5 + $0x700] sm:$0xff] }
 0x38b   :  { %773 = vmatprep.subr.mxu0 %v732_v55 }
 0x38c   :  { %774 = vmatpush1.msra.mxu0 %v731_v56 }
 0x38d   :  { %775 = vmatprep.subr.mxu0 %v730_v57 }
 0x38e   :  { %776 = vmatpush1.msra.mxu0 %v729_v58  ;;  %v967_v58 = vld [vmem:[#allocation5 + $0x8f8] sm:$0xff] }
 0x38f   :  { %777 = vmatprep.subr.mxu0 %v728_v59  ;;  %v966_v59 = vld [vmem:[#allocation5 + $0x8f0] sm:$0xff] }
 0x390   :  { %778 = vmatpush1.msra.mxu0 %v727_v9  ;;  %v954_v9 = vld [vmem:[#allocation5 + $0x890] sm:$0xff] }
 0x391   :  { %779 = vmatprep.subr.mxu0 %v726_v10  ;;  %v953_v10 = vld [vmem:[#allocation5 + $0x888] sm:$0xff] }
 0x392   :  { %780 = vmatpush1.msra.mxu0 %v725_v46  ;;  %v952_v46 = vld [vmem:[#allocation5 + $0x880] sm:$0xff] }
 0x393   :  { %781 = vmatprep.subr.mxu0 %v724_v11  ;;  %v951_v11 = vld [vmem:[#allocation5 + $0x878] sm:$0xff] }
 0x394   :  { %782 = vmatpush1.msra.mxu0 %v723_v48  ;;  %v950_v48 = vld [vmem:[#allocation5 + $0x870] sm:$0xff] }
 0x395   :  { %783 = vmatprep.subr.mxu0 %v722_v50  ;;  %v949_v50 = vld [vmem:[#allocation5 + $0x868] sm:$0xff] }
 0x396   :  { %784 = vmatpush1.msra.mxu0 %v721_v12  ;;  %v948_v12 = vld [vmem:[#allocation5 + $0x860] sm:$0xff] }
 0x397   :  { %981 = vmatprep.subr.mxu0 %v967_v58 }
 0x437   :  { %v589_v60 = vpop.f32.mrf.mxu0 }
 0x438   :  { %v1735_v61 = vmul.f32 -1.442695, %v589_v60  ;;  %v965_v60 = vld [vmem:[#allocation5 + $0x8e8] sm:$0xff] }
 0x439   :  { %v591_v62 = vpop.f32.mrf.mxu0 }
 0x43a   :  { %1750 = vpow2.f32 %v1735_v61  ;;  %v964_v61 = vld [vmem:[#allocation5 + $0x8e0] sm:$0xff]  ;;  %v963_v62 = vld [vmem:[#allocation5 + $0x8d8] sm:$0xff] }
 0x447   :  { %v1751_v63 = vpop.eup %1750 }
 0x448   :  { %v596_v1 = vadd.f32 1.0, %v1751_v63  ;;  %v962_v63 = vld [vmem:[#allocation5 + $0x8d0] sm:$0xff] }
 0x44a   :  { %1752 = vrcp.f32 %v596_v1  ;;  %v961_v1 = vld [vmem:[#allocation5 + $0x8c8] sm:$0xff] }
 0x457   :  { %v1753_v5 = vpop.eup %1752 }
 0x458   :  { %v599_v7 = vmul.f32 %v1753_v5, %v385_v53  ;;  %v855_v53 = vld [vmem:[#allocation5 + $0x7f0] sm:$0xff] }
 0x459   :  { %v958_v5 = vld [vmem:[#allocation5 + $0x8b0] sm:$0xff] }
 0x45a   :  { %v600_v8 = vadd.f32 %v599_v7, %v384_v6  ;;  %v957_v6 = vld [vmem:[#allocation5 + $0x8a8] sm:$0xff]  ;;  %v956_v7 = vld [vmem:[#allocation5 + $0x8a0] sm:$0xff] }
 0x45c   :  { %712 = vmatmul.mubr.f32.vlgmr.msra.gmra.mxu1 %v600_v8  ;;  %v955_v8 = vld [vmem:[#allocation5 + $0x898] sm:$0xff] }
 0x45d   :  { %921 = vmatprep.mubr.f32.mxu1 %v1857_v0  ;;  %858 = vmatpush1.msra.mxu1 %v855_v53  ;;  %v946_v53 = vld [vmem:[#allocation5 + $0x850] sm:$0xff] }
 0x45e   :  { %859 = vmatprep.subr.mxu1 %v854_v13  ;;  %v945_v13 = vld [vmem:[#allocation5 + $0x848] sm:$0xff] }
 0x45f   :  { %860 = vmatpush1.msra.mxu1 %v853_v14  ;;  %v944_v14 = vld [vmem:[#allocation5 + $0x840] sm:$0xff] }
 0x460   :  { %861 = vmatprep.subr.mxu1 %v852_v15  ;;  %v943_v15 = vld [vmem:[#allocation5 + $0x838] sm:$0xff] }
 0x461   :  { %862 = vmatpush1.msra.mxu1 %v851_v17  ;;  %v942_v17 = vld [vmem:[#allocation5 + $0x830] sm:$0xff] }
 0x462   :  { %863 = vmatprep.subr.mxu1 %v850_v18  ;;  %v941_v18 = vld [vmem:[#allocation5 + $0x828] sm:$0xff] }
 0x463   :  { %864 = vmatpush1.msra.mxu1 %v849_v16  ;;  %v940_v16 = vld [vmem:[#allocation5 + $0x820] sm:$0xff] }
 0x464   :  { %865 = vmatprep.subr.mxu1 %v848_v19  ;;  %v939_v19 = vld [vmem:[#allocation5 + $0x818] sm:$0xff] }
 0x465   :  { %866 = vmatpush1.msra.mxu1 %v847_v20  ;;  %v938_v20 = vld [vmem:[#allocation5 + $0x810] sm:$0xff] }
 0x466   :  { %867 = vmatprep.subr.mxu1 %v846_v21  ;;  %v937_v21 = vld [vmem:[#allocation5 + $0x808] sm:$0xff] }
 0x467   :  { %868 = vmatpush1.msra.mxu1 %v845_v22  ;;  %v936_v22 = vld [vmem:[#allocation5 + $0x800] sm:$0xff] }
 0x468   :  { %869 = vmatprep.subr.mxu1 %v844_v23  ;;  %v1086_v23 = vld [vmem:[#allocation5 + $0x9f8] sm:$0xff] }
 0x469   :  { %870 = vmatpush1.msra.mxu1 %v843_v24  ;;  %v1085_v24 = vld [vmem:[#allocation5 + $0x9f0] sm:$0xff] }
 0x46a   :  { %871 = vmatprep.subr.mxu1 %v842_v25  ;;  %v1084_v25 = vld [vmem:[#allocation5 + $0x9e8] sm:$0xff] }
 0x46b   :  { %872 = vmatpush1.msra.mxu1 %v841_v26  ;;  %v1083_v26 = vld [vmem:[#allocation5 + $0x9e0] sm:$0xff] }
 0x46c   :  { %873 = vmatprep.subr.mxu1 %v840_v27  ;;  %v1082_v27 = vld [vmem:[#allocation5 + $0x9d8] sm:$0xff] }
 0x46d   :  { %874 = vmatpush1.msra.mxu1 %v839_v28  ;;  %v1081_v28 = vld [vmem:[#allocation5 + $0x9d0] sm:$0xff] }
 0x46e   :  { %875 = vmatprep.subr.mxu1 %v838_v29  ;;  %v1080_v29 = vld [vmem:[#allocation5 + $0x9c8] sm:$0xff] }
 0x46f   :  { %876 = vmatpush1.msra.mxu1 %v837_v30  ;;  %v1079_v30 = vld [vmem:[#allocation5 + $0x9c0] sm:$0xff] }
 0x470   :  { %877 = vmatprep.subr.mxu1 %v836_v31  ;;  %v1078_v31 = vld [vmem:[#allocation5 + $0x9b8] sm:$0xff] }
 0x471   :  { %878 = vmatpush1.msra.mxu1 %v835_v32  ;;  %v1077_v32 = vld [vmem:[#allocation5 + $0x9b0] sm:$0xff] }
 0x472   :  { %879 = vmatprep.subr.mxu1 %v834_v33  ;;  %v1076_v33 = vld [vmem:[#allocation5 + $0x9a8] sm:$0xff] }
 0x473   :  { %880 = vmatpush1.msra.mxu1 %v833_v34  ;;  %v1075_v34 = vld [vmem:[#allocation5 + $0x9a0] sm:$0xff] }
 0x474   :  { %881 = vmatprep.subr.mxu1 %v832_v35  ;;  %v1074_v35 = vld [vmem:[#allocation5 + $0x998] sm:$0xff] }
 0x475   :  { %882 = vmatpush1.msra.mxu1 %v831_v36  ;;  %v1073_v36 = vld [vmem:[#allocation5 + $0x990] sm:$0xff] }
 0x476   :  { %883 = vmatprep.subr.mxu1 %v830_v37  ;;  %v1072_v37 = vld [vmem:[#allocation5 + $0x988] sm:$0xff] }
 0x477   :  { %884 = vmatpush1.msra.mxu1 %v829_v38  ;;  %v1071_v38 = vld [vmem:[#allocation5 + $0x980] sm:$0xff] }
 0x478   :  { %885 = vmatprep.subr.mxu1 %v828_v39  ;;  %v1070_v39 = vld [vmem:[#allocation5 + $0x978] sm:$0xff] }
 0x479   :  { %886 = vmatpush1.msra.mxu1 %v827_v49  ;;  %v1067_v49 = vld [vmem:[#allocation5 + $0x960] sm:$0xff] }
 0x47a   :  { %887 = vmatprep.subr.mxu1 %v826_v51  ;;  %v1066_v51 = vld [vmem:[#allocation5 + $0x958] sm:$0xff] }
 0x47b   :  { %888 = vmatpush1.msra.mxu1 %v825_v54  ;;  %v1065_v54 = vld [vmem:[#allocation5 + $0x950] sm:$0xff] }
 0x47c   :  { %1087 = vmatprep.subr.mxu1 %v1086_v23  ;;  %v1172_v23 = vld [vmem:[#allocation5 + $0xa68] sm:$0xff] }
 0x51c   :  { %v1933_v42 = vpop.f32.mrf.mxu1 }
 0x51e   :  { %v715_v43 = vpop.f32.mrf.mxu1 }
 0x51f   :  { %v1935_v44 = vadd.f32 %v715_v43, %v644_v41  ;;  %v1069_v41 = vld [vmem:[#allocation5 + $0x970] sm:$0xff]  ;;  %v1068_v43 = vld [vmem:[#allocation5 + $0x968] sm:$0xff] }
 0x521   :  { %v719_v45 = vmax.f32 %v1935_v44, 0.0  ;;  %v1190_v44 = vld [vmem:[#allocation5 + $0xaf8] sm:$0xff] }
 0x523   :  { %818 = vmatmul.mubr.f32.vlgmr.msra.gmra.mxu0 %v719_v45 }
 0x524   :  { %1045 = vmatprep.mubr.f32.mxu0 %v1857_v0  ;;  %982 = vmatpush1.msra.mxu0 %v966_v59 }
 0x525   :  { %983 = vmatprep.subr.mxu0 %v965_v60 }
 0x526   :  { %984 = vmatpush1.msra.mxu0 %v964_v61 }
 0x527   :  { %985 = vmatprep.subr.mxu0 %v963_v62 }
 0x528   :  { %986 = vmatpush1.msra.mxu0 %v962_v63  ;;  %v640_v63 = vrot.slane %v1929_v40, %v1921_v2  ;;  %v1057_v40 = vld [vmem:[#allocation5 + $0x910] sm:$0xff] }
 0x529   :  { %987 = vmatprep.subr.mxu0 %v961_v1 }
 0x52a   :  { %988 = vmatpush1.msra.mxu0 %v960_v3  ;;  %v714_v1 = vadd.f32 %v1933_v42, %v640_v63  ;;  %v1056_v42 = vld [vmem:[#allocation5 + $0x908] sm:$0xff]  ;;  %v1294_v63 = vld [vmem:[#allocation5 + $0xbc0] sm:$0xff] }
 0x52b   :  { %989 = vmatprep.subr.mxu0 %v959_v4 }
 0x52c   :  { %990 = vmatpush1.msra.mxu0 %v958_v5  ;;  %v718_v4 = vmax.f32 %v714_v1, 0.0  ;;  %v1293_v1 = vld [vmem:[#allocation5 + $0xbb8] sm:$0xff] }
 0x52d   :  { %991 = vmatprep.subr.mxu0 %v957_v6 }
 0x52e   :  { %992 = vmatpush1.msra.mxu0 %v956_v7  ;;  %v1061_v7 = vld [vmem:[#allocation5 + $0x930] sm:$0xff] }
 0x52f   :  { %993 = vmatprep.subr.mxu0 %v955_v8  ;;  %v1060_v8 = vld [vmem:[#allocation5 + $0x928] sm:$0xff] }
 0x530   :  { %994 = vmatpush1.msra.mxu0 %v954_v9  ;;  %v1059_v9 = vld [vmem:[#allocation5 + $0x920] sm:$0xff] }
 0x531   :  { %995 = vmatprep.subr.mxu0 %v953_v10  ;;  %v1058_v10 = vld [vmem:[#allocation5 + $0x918] sm:$0xff] }
 0x532   :  { %996 = vmatpush1.msra.mxu0 %v952_v46  ;;  %v1055_v46 = vld [vmem:[#allocation5 + $0x900] sm:$0xff] }
 0x533   :  { %997 = vmatprep.subr.mxu0 %v951_v11  ;;  %v1188_v11 = vld [vmem:[#allocation5 + $0xae8] sm:$0xff] }
 0x534   :  { %998 = vmatpush1.msra.mxu0 %v950_v48  ;;  %v1187_v48 = vld [vmem:[#allocation5 + $0xae0] sm:$0xff] }
 0x535   :  { %999 = vmatprep.subr.mxu0 %v949_v50  ;;  %v1186_v50 = vld [vmem:[#allocation5 + $0xad8] sm:$0xff] }
 0x536   :  { %1000 = vmatpush1.msra.mxu0 %v948_v12  ;;  %v1185_v12 = vld [vmem:[#allocation5 + $0xad0] sm:$0xff] }
 0x537   :  { %1001 = vmatprep.subr.mxu0 %v947_v52  ;;  %v1184_v52 = vld [vmem:[#allocation5 + $0xac8] sm:$0xff] }
 0x538   :  { %1002 = vmatpush1.msra.mxu0 %v946_v53  ;;  %v1183_v53 = vld [vmem:[#allocation5 + $0xac0] sm:$0xff] }
 0x539   :  { %1003 = vmatprep.subr.mxu0 %v945_v13  ;;  %v1182_v13 = vld [vmem:[#allocation5 + $0xab8] sm:$0xff] }
 0x53a   :  { %1004 = vmatpush1.msra.mxu0 %v944_v14  ;;  %v1181_v14 = vld [vmem:[#allocation5 + $0xab0] sm:$0xff] }
 0x53b   :  { %1005 = vmatprep.subr.mxu0 %v943_v15  ;;  %v1180_v15 = vld [vmem:[#allocation5 + $0xaa8] sm:$0xff] }
 0x53c   :  { %1006 = vmatpush1.msra.mxu0 %v942_v17  ;;  %v1179_v17 = vld [vmem:[#allocation5 + $0xaa0] sm:$0xff] }
 0x53d   :  { %1007 = vmatprep.subr.mxu0 %v941_v18  ;;  %v1178_v18 = vld [vmem:[#allocation5 + $0xa98] sm:$0xff] }
 0x53e   :  { %1008 = vmatpush1.msra.mxu0 %v940_v16  ;;  %v1177_v16 = vld [vmem:[#allocation5 + $0xa90] sm:$0xff] }
 0x53f   :  { %1009 = vmatprep.subr.mxu0 %v939_v19  ;;  %v1176_v19 = vld [vmem:[#allocation5 + $0xa88] sm:$0xff] }
 0x540   :  { %1010 = vmatpush1.msra.mxu0 %v938_v20  ;;  %v1175_v20 = vld [vmem:[#allocation5 + $0xa80] sm:$0xff] }
 0x541   :  { %1011 = vmatprep.subr.mxu0 %v937_v21  ;;  %v1174_v21 = vld [vmem:[#allocation5 + $0xa78] sm:$0xff] }
 0x542   :  { %1012 = vmatpush1.msra.mxu0 %v936_v22  ;;  %v1173_v22 = vld [vmem:[#allocation5 + $0xa70] sm:$0xff] }
 0x543   :  { %1191 = vmatprep.subr.mxu0 %v1190_v44  ;;  %v1281_v44 = vld [vmem:[#allocation5 + $0xb58] sm:$0xff] }
 0x5e3   :  { %v819_v55 = vpop.f32.mrf.mxu0 }
 0x5e4   :  { %v823_v56 = vmax.f32 %v819_v55, 0.0  ;;  %v1064_v55 = vld [vmem:[#allocation5 + $0x948] sm:$0xff] }
 0x5e5   :  { %v821_v57 = vpop.f32.mrf.mxu0 }
 0x5e6   :  { %922 = vmatmul.mubr.f32.vlgmr.msra.gmra.mxu1 %v823_v56  ;;  %v1063_v56 = vld [vmem:[#allocation5 + $0x940] sm:$0xff]  ;;  %v1062_v57 = vld [vmem:[#allocation5 + $0x938] sm:$0xff] }
 0x5e7   :  { %1151 = vmatprep.mubr.f32.mxu1 %v1857_v0  ;;  %1088 = vmatpush1.msra.mxu1 %v1085_v24  ;;  %v1171_v24 = vld [vmem:[#allocation5 + $0xa60] sm:$0xff] }
 0x5e8   :  { %1089 = vmatprep.subr.mxu1 %v1084_v25  ;;  %v1170_v25 = vld [vmem:[#allocation5 + $0xa58] sm:$0xff] }
 0x5e9   :  { %1090 = vmatpush1.msra.mxu1 %v1083_v26  ;;  %v1169_v26 = vld [vmem:[#allocation5 + $0xa50] sm:$0xff] }
 0x5ea   :  { %1091 = vmatprep.subr.mxu1 %v1082_v27  ;;  %v1168_v27 = vld [vmem:[#allocation5 + $0xa48] sm:$0xff] }
 0x5eb   :  { %1092 = vmatpush1.msra.mxu1 %v1081_v28  ;;  %v1167_v28 = vld [vmem:[#allocation5 + $0xa40] sm:$0xff] }
 0x5ec   :  { %1093 = vmatprep.subr.mxu1 %v1080_v29  ;;  %v1166_v29 = vld [vmem:[#allocation5 + $0xa38] sm:$0xff] }
 0x5ed   :  { %1094 = vmatpush1.msra.mxu1 %v1079_v30  ;;  %v1165_v30 = vld [vmem:[#allocation5 + $0xa30] sm:$0xff] }
 0x5ee   :  { %1095 = vmatprep.subr.mxu1 %v1078_v31  ;;  %v1164_v31 = vld [vmem:[#allocation5 + $0xa28] sm:$0xff] }
 0x5ef   :  { %1096 = vmatpush1.msra.mxu1 %v1077_v32  ;;  %v1163_v32 = vld [vmem:[#allocation5 + $0xa20] sm:$0xff] }
 0x5f0   :  { %1097 = vmatprep.subr.mxu1 %v1076_v33  ;;  %v1162_v33 = vld [vmem:[#allocation5 + $0xa18] sm:$0xff] }
 0x5f1   :  { %1098 = vmatpush1.msra.mxu1 %v1075_v34  ;;  %v1948_v34 = vld [vmem:[#allocation7 + $0x2] ss:$8 sm:$0x3] }
 0x5f2   :  { %1099 = vmatprep.subr.mxu1 %v1074_v35  ;;  %v978_v35 = vrot.slane %v1948_v34, %v1905_v47 }
 0x5f3   :  { %1100 = vmatpush1.msra.mxu1 %v1073_v36 }
 0x5f4   :  { %1101 = vmatprep.subr.mxu1 %v1072_v37 }
 0x5f5   :  { %1102 = vmatpush1.msra.mxu1 %v1071_v38 }
 0x5f6   :  { %1103 = vmatprep.subr.mxu1 %v1070_v39 }
 0x5f7   :  { %1104 = vmatpush1.msra.mxu1 %v1069_v41  ;;  %v1161_v41 = vld [vmem:[#allocation5 + $0xa10] sm:$0xff] }
 0x5f8   :  { %1105 = vmatprep.subr.mxu1 %v1068_v43  ;;  %v1160_v43 = vld [vmem:[#allocation5 + $0xa08] sm:$0xff] }
 0x5f9   :  { %1106 = vmatpush1.msra.mxu1 %v1067_v49  ;;  %v1159_v49 = vld [vmem:[#allocation5 + $0xa00] sm:$0xff] }
 0x5fa   :  { %1107 = vmatprep.subr.mxu1 %v1066_v51 }
 0x5fb   :  { %1108 = vmatpush1.msra.mxu1 %v1065_v54 }
 0x5fc   :  { %1109 = vmatprep.subr.mxu1 %v1064_v55 }
 0x5fd   :  { %1110 = vmatpush1.msra.mxu1 %v1063_v56  ;;  %v1301_v56 = vld [vmem:[#allocation5 + $0xbf8] sm:$0xff] }
 0x5fe   :  { %1111 = vmatprep.subr.mxu1 %v1062_v57  ;;  %v1300_v57 = vld [vmem:[#allocation5 + $0xbf0] sm:$0xff] }
 0x5ff   :  { %1112 = vmatpush1.msra.mxu1 %v1061_v7  ;;  %v1288_v7 = vld [vmem:[#allocation5 + $0xb90] sm:$0xff] }
 0x600   :  { %1113 = vmatprep.subr.mxu1 %v1060_v8  ;;  %v1287_v8 = vld [vmem:[#allocation5 + $0xb88] sm:$0xff] }
 0x601   :  { %1114 = vmatpush1.msra.mxu1 %v1059_v9  ;;  %v1286_v9 = vld [vmem:[#allocation5 + $0xb80] sm:$0xff] }
 0x602   :  { %1115 = vmatprep.subr.mxu1 %v1058_v10  ;;  %v1285_v10 = vld [vmem:[#allocation5 + $0xb78] sm:$0xff] }
 0x603   :  { %1116 = vmatpush1.msra.mxu1 %v1057_v40  ;;  %v1284_v40 = vld [vmem:[#allocation5 + $0xb70] sm:$0xff] }
 0x604   :  { %1117 = vmatprep.subr.mxu1 %v1056_v42  ;;  %v1283_v42 = vld [vmem:[#allocation5 + $0xb68] sm:$0xff] }
 0x605   :  { %1118 = vmatpush1.msra.mxu1 %v1055_v46  ;;  %v1282_v46 = vld [vmem:[#allocation5 + $0xb60] sm:$0xff] }
 0x606   :  { %1315 = vmatprep.subr.mxu1 %v1301_v56 }
 0x6a6   :  { %v923_v58 = vpop.f32.mrf.mxu1 }
 0x6a7   :  { %v1736_v59 = vmul.f32 -1.442695, %v923_v58  ;;  %v1299_v58 = vld [vmem:[#allocation5 + $0xbe8] sm:$0xff] }
 0x6a8   :  { %v925_v60 = vpop.f32.mrf.mxu1 }
 0x6a9   :  { %1754 = vpow2.f32 %v1736_v59  ;;  %v1298_v59 = vld [vmem:[#allocation5 + $0xbe0] sm:$0xff]  ;;  %v1297_v60 = vld [vmem:[#allocation5 + $0xbd8] sm:$0xff] }
 0x6b6   :  { %v1755_v61 = vpop.eup %1754 }
 0x6b7   :  { %v930_v62 = vadd.f32 1.0, %v1755_v61  ;;  %v1296_v61 = vld [vmem:[#allocation5 + $0xbd0] sm:$0xff] }
 0x6b9   :  { %1756 = vrcp.f32 %v930_v62  ;;  %v1295_v62 = vld [vmem:[#allocation5 + $0xbc8] sm:$0xff] }
 0x6c6   :  { %v1757_v3 = vpop.eup %1756 }
 0x6c7   :  { %v933_v5 = vmul.f32 %v1757_v3, %v719_v45  ;;  %v1189_v45 = vld [vmem:[#allocation5 + $0xaf0] sm:$0xff] }
 0x6c8   :  { %v1292_v3 = vld [vmem:[#allocation5 + $0xbb0] sm:$0xff] }
 0x6c9   :  { %v934_v6 = vadd.f32 %v933_v5, %v718_v4  ;;  %v1291_v4 = vld [vmem:[#allocation5 + $0xba8] sm:$0xff]  ;;  %v1290_v5 = vld [vmem:[#allocation5 + $0xba0] sm:$0xff] }
 0x6cb   :  { %1046 = vmatmul.mubr.f32.vlgmr.msra.gmra.mxu0 %v934_v6  ;;  %v1289_v6 = vld [vmem:[#allocation5 + $0xb98] sm:$0xff] }
 0x6cc   :  { %1255 = vmatprep.mubr.f32.mxu0 %v1857_v0  ;;  %1192 = vmatpush1.msra.mxu0 %v1189_v45  ;;  %v1280_v45 = vld [vmem:[#allocation5 + $0xb50] sm:$0xff] }
 0x6cd   :  { %1193 = vmatprep.subr.mxu0 %v1188_v11  ;;  %v1279_v11 = vld [vmem:[#allocation5 + $0xb48] sm:$0xff] }
 0x6ce   :  { %1194 = vmatpush1.msra.mxu0 %v1187_v48  ;;  %v1278_v48 = vld [vmem:[#allocation5 + $0xb40] sm:$0xff] }
 0x6cf   :  { %1195 = vmatprep.subr.mxu0 %v1186_v50  ;;  %v1277_v50 = vld [vmem:[#allocation5 + $0xb38] sm:$0xff] }
 0x6d0   :  { %1196 = vmatpush1.msra.mxu0 %v1185_v12  ;;  %v1276_v12 = vld [vmem:[#allocation5 + $0xb30] sm:$0xff] }
 0x6d1   :  { %1197 = vmatprep.subr.mxu0 %v1184_v52  ;;  %v1275_v52 = vld [vmem:[#allocation5 + $0xb28] sm:$0xff] }
 0x6d2   :  { %1198 = vmatpush1.msra.mxu0 %v1183_v53  ;;  %v1274_v53 = vld [vmem:[#allocation5 + $0xb20] sm:$0xff] }
 0x6d3   :  { %1199 = vmatprep.subr.mxu0 %v1182_v13  ;;  %v1273_v13 = vld [vmem:[#allocation5 + $0xb18] sm:$0xff] }
 0x6d4   :  { %1200 = vmatpush1.msra.mxu0 %v1181_v14  ;;  %v1272_v14 = vld [vmem:[#allocation5 + $0xb10] sm:$0xff] }
 0x6d5   :  { %1201 = vmatprep.subr.mxu0 %v1180_v15  ;;  %v1271_v15 = vld [vmem:[#allocation5 + $0xb08] sm:$0xff] }
 0x6d6   :  { %1202 = vmatpush1.msra.mxu0 %v1179_v17  ;;  %v1270_v17 = vld [vmem:[#allocation5 + $0xb00] sm:$0xff] }
 0x6d7   :  { %1203 = vmatprep.subr.mxu0 %v1178_v18  ;;  %v1420_v18 = vld [vmem:[#allocation5 + $0xcf8] sm:$0xff] }
 0x6d8   :  { %1204 = vmatpush1.msra.mxu0 %v1177_v16  ;;  %v1419_v16 = vld [vmem:[#allocation5 + $0xcf0] sm:$0xff] }
 0x6d9   :  { %1205 = vmatprep.subr.mxu0 %v1176_v19  ;;  %v1418_v19 = vld [vmem:[#allocation5 + $0xce8] sm:$0xff] }
 0x6da   :  { %1206 = vmatpush1.msra.mxu0 %v1175_v20  ;;  %v1417_v20 = vld [vmem:[#allocation5 + $0xce0] sm:$0xff] }
 0x6db   :  { %1207 = vmatprep.subr.mxu0 %v1174_v21  ;;  %v1416_v21 = vld [vmem:[#allocation5 + $0xcd8] sm:$0xff] }
 0x6dc   :  { %1208 = vmatpush1.msra.mxu0 %v1173_v22  ;;  %v1415_v22 = vld [vmem:[#allocation5 + $0xcd0] sm:$0xff] }
 0x6dd   :  { %1209 = vmatprep.subr.mxu0 %v1172_v23  ;;  %v1414_v23 = vld [vmem:[#allocation5 + $0xcc8] sm:$0xff] }
 0x6de   :  { %1210 = vmatpush1.msra.mxu0 %v1171_v24  ;;  %v1413_v24 = vld [vmem:[#allocation5 + $0xcc0] sm:$0xff] }
 0x6df   :  { %1211 = vmatprep.subr.mxu0 %v1170_v25  ;;  %v1412_v25 = vld [vmem:[#allocation5 + $0xcb8] sm:$0xff] }
 0x6e0   :  { %1212 = vmatpush1.msra.mxu0 %v1169_v26  ;;  %v1411_v26 = vld [vmem:[#allocation5 + $0xcb0] sm:$0xff] }
 0x6e1   :  { %1213 = vmatprep.subr.mxu0 %v1168_v27  ;;  %v1410_v27 = vld [vmem:[#allocation5 + $0xca8] sm:$0xff] }
 0x6e2   :  { %1214 = vmatpush1.msra.mxu0 %v1167_v28  ;;  %v1409_v28 = vld [vmem:[#allocation5 + $0xca0] sm:$0xff] }
 0x6e3   :  { %1215 = vmatprep.subr.mxu0 %v1166_v29  ;;  %v1408_v29 = vld [vmem:[#allocation5 + $0xc98] sm:$0xff] }
 0x6e4   :  { %1216 = vmatpush1.msra.mxu0 %v1165_v30  ;;  %v1407_v30 = vld [vmem:[#allocation5 + $0xc90] sm:$0xff] }
 0x6e5   :  { %1217 = vmatprep.subr.mxu0 %v1164_v31  ;;  %v1406_v31 = vld [vmem:[#allocation5 + $0xc88] sm:$0xff] }
 0x6e6   :  { %1218 = vmatpush1.msra.mxu0 %v1163_v32  ;;  %v1405_v32 = vld [vmem:[#allocation5 + $0xc80] sm:$0xff] }
 0x6e7   :  { %1219 = vmatprep.subr.mxu0 %v1162_v33  ;;  %v1404_v33 = vld [vmem:[#allocation5 + $0xc78] sm:$0xff] }
 0x6e8   :  { %1220 = vmatpush1.msra.mxu0 %v1161_v41  ;;  %v1401_v41 = vld [vmem:[#allocation5 + $0xc60] sm:$0xff] }
 0x6e9   :  { %1221 = vmatprep.subr.mxu0 %v1160_v43  ;;  %v1400_v43 = vld [vmem:[#allocation5 + $0xc58] sm:$0xff] }
 0x6ea   :  { %1222 = vmatpush1.msra.mxu0 %v1159_v49  ;;  %v1399_v49 = vld [vmem:[#allocation5 + $0xc50] sm:$0xff] }
 0x6eb   :  { %1421 = vmatprep.subr.mxu0 %v1420_v18  ;;  %v1506_v18 = vld [vmem:[#allocation5 + $0xd68] sm:$0xff] }
 0x78b   :  { %v1952_v36 = vpop.f32.mrf.mxu0 }
 0x78d   :  { %v1049_v37 = vpop.f32.mrf.mxu0 }
 0x78e   :  { %v1954_v38 = vadd.f32 %v1049_v37, %v978_v35  ;;  %v1403_v35 = vld [vmem:[#allocation5 + $0xc70] sm:$0xff]  ;;  %v1402_v37 = vld [vmem:[#allocation5 + $0xc68] sm:$0xff] }
 0x790   :  { %v1053_v39 = vmax.f32 %v1954_v38, 0.0  ;;  %v1524_v38 = vld [vmem:[#allocation5 + $0xdf8] sm:$0xff] }
 0x792   :  { %1152 = vmatmul.mubr.f32.vlgmr.msra.gmra.mxu1 %v1053_v39 }
 0x793   :  { %1379 = vmatprep.mubr.f32.mxu1 %v1857_v0  ;;  %1316 = vmatpush1.msra.mxu1 %v1300_v57 }
 0x794   :  { %1317 = vmatprep.subr.mxu1 %v1299_v58 }
 0x795   :  { %1318 = vmatpush1.msra.mxu1 %v1298_v59 }
 0x796   :  { %1319 = vmatprep.subr.mxu1 %v1297_v60 }
 0x797   :  { %1320 = vmatpush1.msra.mxu1 %v1296_v61  ;;  %v974_v61 = vrot.slane %v1948_v34, %v1921_v2  ;;  %v1391_v34 = vld [vmem:[#allocation5 + $0xc10] sm:$0xff] }
 0x798   :  { %1321 = vmatprep.subr.mxu1 %v1295_v62 }
 0x799   :  { %1322 = vmatpush1.msra.mxu1 %v1294_v63  ;;  %v1048_v62 = vadd.f32 %v1952_v36, %v974_v61  ;;  %v1390_v36 = vld [vmem:[#allocation5 + $0xc08] sm:$0xff]  ;;  %v1626_v61 = vld [vmem:[#allocation5 + $0xeb0] sm:$0xff] }
 0x79a   :  { %1323 = vmatprep.subr.mxu1 %v1293_v1 }
 0x79b   :  { %1324 = vmatpush1.msra.mxu1 %v1292_v3  ;;  %v1052_v1 = vmax.f32 %v1048_v62, 0.0  ;;  %v1625_v62 = vld [vmem:[#allocation5 + $0xea8] sm:$0xff] }
 0x79c   :  { %1325 = vmatprep.subr.mxu1 %v1291_v4 }
 0x79d   :  { %1326 = vmatpush1.msra.mxu1 %v1290_v5  ;;  %v1395_v5 = vld [vmem:[#allocation5 + $0xc30] sm:$0xff] }
 0x79e   :  { %1327 = vmatprep.subr.mxu1 %v1289_v6  ;;  %v1394_v6 = vld [vmem:[#allocation5 + $0xc28] sm:$0xff] }
 0x79f   :  { %1328 = vmatpush1.msra.mxu1 %v1288_v7  ;;  %v1393_v7 = vld [vmem:[#allocation5 + $0xc20] sm:$0xff] }
 0x7a0   :  { %1329 = vmatprep.subr.mxu1 %v1287_v8  ;;  %v1392_v8 = vld [vmem:[#allocation5 + $0xc18] sm:$0xff] }
 0x7a1   :  { %1330 = vmatpush1.msra.mxu1 %v1286_v9  ;;  %v1389_v9 = vld [vmem:[#allocation5 + $0xc00] sm:$0xff] }
 0x7a2   :  { %1331 = vmatprep.subr.mxu1 %v1285_v10  ;;  %v1522_v10 = vld [vmem:[#allocation5 + $0xde8] sm:$0xff] }
 0x7a3   :  { %1332 = vmatpush1.msra.mxu1 %v1284_v40  ;;  %v1521_v40 = vld [vmem:[#allocation5 + $0xde0] sm:$0xff] }
 0x7a4   :  { %1333 = vmatprep.subr.mxu1 %v1283_v42  ;;  %v1520_v42 = vld [vmem:[#allocation5 + $0xdd8] sm:$0xff] }
 0x7a5   :  { %1334 = vmatpush1.msra.mxu1 %v1282_v46  ;;  %v1519_v46 = vld [vmem:[#allocation5 + $0xdd0] sm:$0xff] }
 0x7a6   :  { %1335 = vmatprep.subr.mxu1 %v1281_v44  ;;  %v1518_v44 = vld [vmem:[#allocation5 + $0xdc8] sm:$0xff] }
 0x7a7   :  { %1336 = vmatpush1.msra.mxu1 %v1280_v45  ;;  %v1517_v45 = vld [vmem:[#allocation5 + $0xdc0] sm:$0xff] }
 0x7a8   :  { %1337 = vmatprep.subr.mxu1 %v1279_v11  ;;  %v1516_v11 = vld [vmem:[#allocation5 + $0xdb8] sm:$0xff] }
 0x7a9   :  { %1338 = vmatpush1.msra.mxu1 %v1278_v48  ;;  %v1515_v48 = vld [vmem:[#allocation5 + $0xdb0] sm:$0xff] }
 0x7aa   :  { %1339 = vmatprep.subr.mxu1 %v1277_v50  ;;  %v1514_v50 = vld [vmem:[#allocation5 + $0xda8] sm:$0xff] }
 0x7ab   :  { %1340 = vmatpush1.msra.mxu1 %v1276_v12  ;;  %v1513_v12 = vld [vmem:[#allocation5 + $0xda0] sm:$0xff] }
 0x7ac   :  { %1341 = vmatprep.subr.mxu1 %v1275_v52  ;;  %v1512_v52 = vld [vmem:[#allocation5 + $0xd98] sm:$0xff] }
 0x7ad   :  { %1342 = vmatpush1.msra.mxu1 %v1274_v53  ;;  %v1511_v53 = vld [vmem:[#allocation5 + $0xd90] sm:$0xff] }
 0x7ae   :  { %1343 = vmatprep.subr.mxu1 %v1273_v13  ;;  %v1510_v13 = vld [vmem:[#allocation5 + $0xd88] sm:$0xff] }
 0x7af   :  { %1344 = vmatpush1.msra.mxu1 %v1272_v14  ;;  %v1509_v14 = vld [vmem:[#allocation5 + $0xd80] sm:$0xff] }
 0x7b0   :  { %1345 = vmatprep.subr.mxu1 %v1271_v15  ;;  %v1508_v15 = vld [vmem:[#allocation5 + $0xd78] sm:$0xff] }
 0x7b1   :  { %1346 = vmatpush1.msra.mxu1 %v1270_v17  ;;  %v1507_v17 = vld [vmem:[#allocation5 + $0xd70] sm:$0xff] }
 0x7b2   :  { %1525 = vmatprep.subr.mxu1 %v1524_v38  ;;  %v1613_v38 = vld [vmem:[#allocation5 + $0xe48] sm:$0xff] }
 0x852   :  { %v1153_v51 = vpop.f32.mrf.mxu1 }
 0x853   :  { %v1157_v54 = vmax.f32 %v1153_v51, 0.0  ;;  %v1398_v51 = vld [vmem:[#allocation5 + $0xc48] sm:$0xff] }
 0x854   :  { %v1155_v55 = vpop.f32.mrf.mxu1 }
 0x855   :  { %1256 = vmatmul.mubr.f32.vlgmr.msra.gmra.mxu0 %v1157_v54  ;;  %v1397_v54 = vld [vmem:[#allocation5 + $0xc40] sm:$0xff]  ;;  %v1396_v55 = vld [vmem:[#allocation5 + $0xc38] sm:$0xff] }
 0x856   :  { %1485 = vmatprep.mubr.f32.mxu0 %v1857_v0  ;;  %1422 = vmatpush1.msra.mxu0 %v1419_v16  ;;  %v1505_v16 = vld [vmem:[#allocation5 + $0xd60] sm:$0xff] }
 0x857   :  { %1423 = vmatprep.subr.mxu0 %v1418_v19  ;;  %v1504_v19 = vld [vmem:[#allocation5 + $0xd58] sm:$0xff] }
 0x858   :  { %1424 = vmatpush1.msra.mxu0 %v1417_v20  ;;  %v1503_v20 = vld [vmem:[#allocation5 + $0xd50] sm:$0xff] }
 0x859   :  { %1425 = vmatprep.subr.mxu0 %v1416_v21  ;;  %v1502_v21 = vld [vmem:[#allocation5 + $0xd48] sm:$0xff] }
 0x85a   :  { %1426 = vmatpush1.msra.mxu0 %v1415_v22  ;;  %v1501_v22 = vld [vmem:[#allocation5 + $0xd40] sm:$0xff] }
 0x85b   :  { %1427 = vmatprep.subr.mxu0 %v1414_v23  ;;  %v1500_v23 = vld [vmem:[#allocation5 + $0xd38] sm:$0xff] }
 0x85c   :  { %1428 = vmatpush1.msra.mxu0 %v1413_v24  ;;  %v1499_v24 = vld [vmem:[#allocation5 + $0xd30] sm:$0xff] }
 0x85d   :  { %1429 = vmatprep.subr.mxu0 %v1412_v25  ;;  %v1498_v25 = vld [vmem:[#allocation5 + $0xd28] sm:$0xff] }
 0x85e   :  { %1430 = vmatpush1.msra.mxu0 %v1411_v26  ;;  %v1497_v26 = vld [vmem:[#allocation5 + $0xd20] sm:$0xff] }
 0x85f   :  { %1431 = vmatprep.subr.mxu0 %v1410_v27  ;;  %v1496_v27 = vld [vmem:[#allocation5 + $0xd18] sm:$0xff] }
 0x860   :  { %1432 = vmatpush1.msra.mxu0 %v1409_v28  ;;  %v1967_v28 = vld [vmem:[#allocation7 + $0x3] ss:$8 sm:$0x3] }
 0x861   :  { %1433 = vmatprep.subr.mxu0 %v1408_v29  ;;  %v1312_v29 = vrot.slane %v1967_v28, %v1905_v47 }
 0x862   :  { %1434 = vmatpush1.msra.mxu0 %v1407_v30 }
 0x863   :  { %1435 = vmatprep.subr.mxu0 %v1406_v31 }
 0x864   :  { %1436 = vmatpush1.msra.mxu0 %v1405_v32 }
 0x865   :  { %1437 = vmatprep.subr.mxu0 %v1404_v33 }
 0x866   :  { %1438 = vmatpush1.msra.mxu0 %v1403_v35  ;;  %v1495_v35 = vld [vmem:[#allocation5 + $0xd10] sm:$0xff] }
 0x867   :  { %1439 = vmatprep.subr.mxu0 %v1402_v37  ;;  %v1494_v37 = vld [vmem:[#allocation5 + $0xd08] sm:$0xff] }
 0x868   :  { %1440 = vmatpush1.msra.mxu0 %v1401_v41  ;;  %v1493_v41 = vld [vmem:[#allocation5 + $0xd00] sm:$0xff] }
 0x869   :  { %1441 = vmatprep.subr.mxu0 %v1400_v43 }
 0x86a   :  { %1442 = vmatpush1.msra.mxu0 %v1399_v49 }
 0x86b   :  { %1443 = vmatprep.subr.mxu0 %v1398_v51  ;;  %v1635_v51 = vld [vmem:[#allocation5 + $0xef8] sm:$0xff] }
 0x86c   :  { %1444 = vmatpush1.msra.mxu0 %v1397_v54  ;;  %v1634_v54 = vld [vmem:[#allocation5 + $0xef0] sm:$0xff] }
 0x86d   :  { %1445 = vmatprep.subr.mxu0 %v1396_v55  ;;  %v1633_v55 = vld [vmem:[#allocation5 + $0xee8] sm:$0xff] }
 0x86e   :  { %1446 = vmatpush1.msra.mxu0 %v1395_v5  ;;  %v1620_v5 = vld [vmem:[#allocation5 + $0xe80] sm:$0xff] }
 0x86f   :  { %1447 = vmatprep.subr.mxu0 %v1394_v6  ;;  %v1619_v6 = vld [vmem:[#allocation5 + $0xe78] sm:$0xff] }
 0x870   :  { %1448 = vmatpush1.msra.mxu0 %v1393_v7  ;;  %v1618_v7 = vld [vmem:[#allocation5 + $0xe70] sm:$0xff] }
 0x871   :  { %1449 = vmatprep.subr.mxu0 %v1392_v8  ;;  %v1617_v8 = vld [vmem:[#allocation5 + $0xe68] sm:$0xff] }
 0x872   :  { %1450 = vmatpush1.msra.mxu0 %v1391_v34  ;;  %v1616_v34 = vld [vmem:[#allocation5 + $0xe60] sm:$0xff] }
 0x873   :  { %1451 = vmatprep.subr.mxu0 %v1390_v36  ;;  %v1615_v36 = vld [vmem:[#allocation5 + $0xe58] sm:$0xff] }
 0x874   :  { %1452 = vmatpush1.msra.mxu0 %v1389_v9  ;;  %v1614_v9 = vld [vmem:[#allocation5 + $0xe50] sm:$0xff] }
 0x875   :  { %1636 = vmatprep.subr.mxu0 %v1635_v51 }
 0x915   :  { %v1257_v56 = vpop.f32.mrf.mxu0 }
 0x916   :  { %v1737_v57 = vmul.f32 -1.442695, %v1257_v56  ;;  %v1632_v56 = vld [vmem:[#allocation5 + $0xee0] sm:$0xff] }
 0x917   :  { %v1259_v58 = vpop.f32.mrf.mxu0 }
 0x918   :  { %1758 = vpow2.f32 %v1737_v57  ;;  %v1631_v57 = vld [vmem:[#allocation5 + $0xed8] sm:$0xff]  ;;  %v1629_v58 = vld [vmem:[#allocation5 + $0xec8] sm:$0xff] }
 0x925   :  { %v1759_v59 = vpop.eup %1758 }
 0x926   :  { %v1264_v60 = vadd.f32 1.0, %v1759_v59  ;;  %v1628_v59 = vld [vmem:[#allocation5 + $0xec0] sm:$0xff] }
 0x928   :  { %1760 = vrcp.f32 %v1264_v60  ;;  %v1627_v60 = vld [vmem:[#allocation5 + $0xeb8] sm:$0xff] }
 0x935   :  { %v1761_v63 = vpop.eup %1760 }
 0x936   :  { %v1267_v3 = vmul.f32 %v1761_v63, %v1053_v39  ;;  %v1523_v39 = vld [vmem:[#allocation5 + $0xdf0] sm:$0xff]  ;;  %v1624_v63 = vld [vmem:[#allocation5 + $0xea0] sm:$0xff] }
 0x938   :  { %v1268_v4 = vadd.f32 %v1267_v3, %v1052_v1  ;;  %v1623_v1 = vld [vmem:[#allocation5 + $0xe98] sm:$0xff]  ;;  %v1622_v3 = vld [vmem:[#allocation5 + $0xe90] sm:$0xff] }
 0x93a   :  { %1380 = vmatmul.mubr.f32.vlgmr.msra.gmra.mxu1 %v1268_v4  ;;  %v1621_v4 = vld [vmem:[#allocation5 + $0xe88] sm:$0xff] }
 0x93b   :  { %1589 = vmatprep.mubr.f32.mxu1 %v1857_v0  ;;  %1526 = vmatpush1.msra.mxu1 %v1523_v39  ;;  %v1612_v39 = vld [vmem:[#allocation5 + $0xe40] sm:$0xff] }
 0x93c   :  { %1527 = vmatprep.subr.mxu1 %v1522_v10  ;;  %v1611_v10 = vld [vmem:[#allocation5 + $0xe38] sm:$0xff] }
 0x93d   :  { %1528 = vmatpush1.msra.mxu1 %v1521_v40  ;;  %v1610_v40 = vld [vmem:[#allocation5 + $0xe30] sm:$0xff] }
 0x93e   :  { %1529 = vmatprep.subr.mxu1 %v1520_v42  ;;  %v1609_v42 = vld [vmem:[#allocation5 + $0xe28] sm:$0xff] }
 0x93f   :  { %1530 = vmatpush1.msra.mxu1 %v1519_v46  ;;  %v1608_v46 = vld [vmem:[#allocation5 + $0xe20] sm:$0xff] }
 0x940   :  { %1531 = vmatprep.subr.mxu1 %v1518_v44  ;;  %v1607_v44 = vld [vmem:[#allocation5 + $0xe18] sm:$0xff] }
 0x941   :  { %1532 = vmatpush1.msra.mxu1 %v1517_v45  ;;  %v1606_v45 = vld [vmem:[#allocation5 + $0xe10] sm:$0xff] }
 0x942   :  { %1533 = vmatprep.subr.mxu1 %v1516_v11  ;;  %v1605_v11 = vld [vmem:[#allocation5 + $0xe08] sm:$0xff] }
 0x943   :  { %1534 = vmatpush1.msra.mxu1 %v1515_v48  ;;  %v1604_v48 = vld [vmem:[#allocation5 + $0xe00] sm:$0xff] }
 0x944   :  { %1535 = vmatprep.subr.mxu1 %v1514_v50 }
 0x945   :  { %1536 = vmatpush1.msra.mxu1 %v1513_v12 }
 0x946   :  { %1537 = vmatprep.subr.mxu1 %v1512_v52 }
 0x947   :  { %1538 = vmatpush1.msra.mxu1 %v1511_v53 }
 0x948   :  { %1539 = vmatprep.subr.mxu1 %v1510_v13 }
 0x949   :  { %1540 = vmatpush1.msra.mxu1 %v1509_v14  ;;  %v1308_v14 = vrot.slane %v1967_v28, %v1921_v2 }
 0x94a   :  { %1541 = vmatprep.subr.mxu1 %v1508_v15 }
 0x94b   :  { %1542 = vmatpush1.msra.mxu1 %v1507_v17 }
 0x94c   :  { %1543 = vmatprep.subr.mxu1 %v1506_v18 }
 0x94d   :  { %1544 = vmatpush1.msra.mxu1 %v1505_v16 }
 0x94e   :  { %1545 = vmatprep.subr.mxu1 %v1504_v19 }
 0x94f   :  { %1546 = vmatpush1.msra.mxu1 %v1503_v20  ;;  %v1707_v20 = vld [vmem:[#allocation7 + $0x4] ss:$8 sm:$0x3] }
 0x950   :  { %1547 = vmatprep.subr.mxu1 %v1502_v21  ;;  %v1712_v21 = vrot.slane %v1707_v20, %v1921_v2 }
 0x951   :  { %1548 = vmatpush1.msra.mxu1 %v1501_v22 }
 0x952   :  { %1549 = vmatprep.subr.mxu1 %v1500_v23 }
 0x953   :  { %1550 = vmatpush1.msra.mxu1 %v1499_v24 }
 0x954   :  { %1551 = vmatprep.subr.mxu1 %v1498_v25 }
 0x955   :  { %1552 = vmatpush1.msra.mxu1 %v1497_v26 }
 0x956   :  { %1553 = vmatprep.subr.mxu1 %v1496_v27 }
 0x957   :  { %1554 = vmatpush1.msra.mxu1 %v1495_v35 }
 0x958   :  { %1555 = vmatprep.subr.mxu1 %v1494_v37 }
 0x959   :  { %1556 = vmatpush1.msra.mxu1 %v1493_v41 }
 0x9fa   :  { %v1971_v30 = vpop.f32.mrf.mxu1 }
 0x9fb   :  { %v1382_v15 = vadd.f32 %v1971_v30, %v1308_v14 }
 0x9fc   :  { %v1383_v31 = vpop.f32.mrf.mxu1 }
 0x9fd   :  { %v1973_v32 = vadd.f32 %v1383_v31, %v1312_v29  ;;  %v1386_v18 = vmax.f32 %v1382_v15, 0.0 }
 0x9ff   :  { %v1387_v33 = vmax.f32 %v1973_v32, 0.0 }
 0xa01   :  { %1486 = vmatmul.mubr.f32.vlgmr.msra.gmra.mxu0 %v1387_v33 }
 0xa02   :  { %1700 = vmatprep.mubr.f32.mxu0 %v1857_v0  ;;  %1637 = vmatpush1.msra.mxu0 %v1634_v54  ;;  %v1630_v0 = vld [vmem:[#allocation5 + $0xed0] sm:$0xff] }
 0xa03   :  { %1638 = vmatprep.subr.mxu0 %v1633_v55 }
 0xa04   :  { %1639 = vmatpush1.msra.mxu0 %v1632_v56 }
 0xa05   :  { %1640 = vmatprep.subr.mxu0 %v1631_v57 }
 0xa06   :  { %1641 = vmatpush1.msra.mxu0 %v1630_v0 }
 0xa07   :  { %1642 = vmatprep.subr.mxu0 %v1629_v58 }
 0xa08   :  { %1643 = vmatpush1.msra.mxu0 %v1628_v59 }
 0xa09   :  { %1644 = vmatprep.subr.mxu0 %v1627_v60 }
 0xa0a   :  { %1645 = vmatpush1.msra.mxu0 %v1626_v61 }
 0xa0b   :  { %1646 = vmatprep.subr.mxu0 %v1625_v62 }
 0xa0c   :  { %1647 = vmatpush1.msra.mxu0 %v1624_v63 }
 0xa0d   :  { %1648 = vmatprep.subr.mxu0 %v1623_v1 }
 0xa0e   :  { %1649 = vmatpush1.msra.mxu0 %v1622_v3 }
 0xa0f   :  { %1650 = vmatprep.subr.mxu0 %v1621_v4 }
 0xa10   :  { %1651 = vmatpush1.msra.mxu0 %v1620_v5 }
 0xa11   :  { %1652 = vmatprep.subr.mxu0 %v1619_v6 }
 0xa12   :  { %1653 = vmatpush1.msra.mxu0 %v1618_v7 }
 0xa13   :  { %1654 = vmatprep.subr.mxu0 %v1617_v8 }
 0xa14   :  { %1655 = vmatpush1.msra.mxu0 %v1616_v34 }
 0xa15   :  { %1656 = vmatprep.subr.mxu0 %v1615_v36 }
 0xa16   :  { %1657 = vmatpush1.msra.mxu0 %v1614_v9 }
 0xa17   :  { %1658 = vmatprep.subr.mxu0 %v1613_v38 }
 0xa18   :  { %1659 = vmatpush1.msra.mxu0 %v1612_v39 }
 0xa19   :  { %1660 = vmatprep.subr.mxu0 %v1611_v10 }
 0xa1a   :  { %1661 = vmatpush1.msra.mxu0 %v1610_v40 }
 0xa1b   :  { %1662 = vmatprep.subr.mxu0 %v1609_v42 }
 0xa1c   :  { %1663 = vmatpush1.msra.mxu0 %v1608_v46 }
 0xa1d   :  { %1664 = vmatprep.subr.mxu0 %v1607_v44 }
 0xa1e   :  { %1665 = vmatpush1.msra.mxu0 %v1606_v45 }
 0xa1f   :  { %1666 = vmatprep.subr.mxu0 %v1605_v11 }
 0xa20   :  { %1667 = vmatpush1.msra.mxu0 %v1604_v48 }
 0xac1   :  { %v1487_v43 = vpop.f32.mrf.mxu0 }
 0xac2   :  { %v1491_v47 = vmax.f32 %v1487_v43, 0.0 }
 0xac3   :  { %v1489_v49 = vpop.f32.mrf.mxu0 }
 0xac4   :  { %1590 = vmatmul.mubr.f32.vlgmr.msra.gmra.mxu1 %v1491_v47 }
 0xb84   :  { %v1591_v50 = vpop.f32.mrf.mxu1 }
 0xb85   :  { %v1738_v12 = vmul.f32 -1.442695, %v1591_v50 }
 0xb86   :  { %v1593_v52 = vpop.f32.mrf.mxu1 }
 0xb87   :  { %1762 = vpow2.f32 %v1738_v12 }
 0xb94   :  { %v1763_v53 = vpop.eup %1762 }
 0xb95   :  { %v1598_v13 = vadd.f32 1.0, %v1763_v53 }
 0xb97   :  { %1764 = vrcp.f32 %v1598_v13 }
 0xba4   :  { %v1765_v17 = vpop.eup %1764 }
 0xba5   :  { %v1601_v16 = vmul.f32 %v1765_v17, %v1387_v33 }
 0xba7   :  { %v1602_v19 = vadd.f32 %v1601_v16, %v1386_v18 }
 0xba9   :  { %1701 = vmatmul.mubr.f32.vlgmr.msra.gmra.mxu0 %v1602_v19 }
 0xc69   :  { %v1702_v22 = vpop.f32.mrf.mxu0 }
 0xc6a   :  { %v1714_v23 = vadd.f32 %v1712_v21, %v1702_v22 }
 0xc6b   :  { %v1704_v24 = vpop.f32.mrf.mxu0 }
 0xc6c   :  { %1716 = vst.msk [vmem:[#allocation8] sm:$0xff] %vm1715_vm1, %v1714_v23 }
 0xc6d   :  { %1837 = shalt.err (!%p1834_p5)
}
 0xc6e   :  { %1726 = dma.vmem_to_hbm [thread:$0]  %s1724_s2, 128, %s1991_s3, [#allocation4]  }
 0xc6f   :  { %1850 = dma.done.wait [#allocation4], 128  }
 0xc70   :  { %1851 = vsyncadd [#allocation4], 4294967168 }
 0xc71   :  { %1730 = vsyncpa [#allocation3], 1 }
 0xc72   :  { %1731 = vsyncpa [#allocation6], 1 }
 0xc73   :  { %1732 = vsyncpa [#allocation4], 1 }

</bundles_post_ra>
